<compile_context>
chip_gen: v7x
topology: tpu7x:2x2x1
jax: 0.10.0
libtpu: 0.0.40
codegen_flags: <defaults>
</compile_context>

<pallas_src>
import functools

import jax
import jax.numpy as jnp
from jax.experimental import pallas as pl
from jax.experimental.pallas import tpu as pltpu


_NEG_PAD = -1.0e30  # bias for padded class lanes: never the row max, exp() -> 0


def _round_up(x, m):
    return (x + m - 1) // m * m


# ---------------------------------------------------------------------------
# Fused per-graph forward kernel (one grid step == one graph)
# ---------------------------------------------------------------------------

def _fused_forward_kernel(x_ref, adj_ref, *refs, num_gnn, num_mlp):
    """Whole CoraNodeClassification forward for one graph.

    refs layout (Pallas passes in_refs then out_refs):
      [gnn_wstack_0 .. gnn_wstack_{num_gnn-1},   # (2*in, out) == [W_self^T ; W_neigh^T]
       mlp_w_0, mlp_b_0, .. ,                    # (in, out), (1, out); last layer lane-padded
       out_ref]                                  # (N, padded_classes)
    """
    gnn_ws = refs[:num_gnn]
    mlp_ws = refs[num_gnn:num_gnn + 2 * num_mlp]
    o_ref = refs[num_gnn + 2 * num_mlp]

    x = x_ref[...].astype(jnp.float32)
    adj = adj_ref[...].astype(jnp.float32)

    # ---- GNN stack: h = [x | adj @ x] @ [W_self^T ; W_neigh^T]
    # Stacked-K form: one MXU matmul with K = 2*in, no lane slices, no extra add.
    for li in range(num_gnn):
        wstack = gnn_ws[li][...]                                    # (2*in, out)
        xa = jnp.dot(adj, x, preferred_element_type=jnp.float32)    # (N, in)
        xcat = jnp.concatenate([x, xa], axis=1)                     # (N, 2*in)
        h = jnp.dot(xcat, wstack, preferred_element_type=jnp.float32)
        if li < num_gnn - 1:          # hidden GNN layers: ReLU; out_layer: none
            h = jnp.maximum(h, 0.0)
        x = h

    # ---- MLP stack: h = x @ W^T + b
    for li in range(num_mlp):
        w = mlp_ws[2 * li][...]                                     # (in, out)
        b = mlp_ws[2 * li + 1][...]                                 # (1, out)
        h = jnp.dot(x, w, preferred_element_type=jnp.float32) + b
        if li < num_mlp - 1:
            h = jnp.maximum(h, 0.0)
        x = h

    # ---- log_softmax over classes (padded lanes carry bias -1e30 -> exp == 0)
    m = jnp.max(x, axis=-1, keepdims=True)
    z = x - m
    lse = jnp.log(jnp.sum(jnp.exp(z), axis=-1, keepdims=True))
    o_ref[...] = (z - lse).astype(o_ref.dtype)


# ---------------------------------------------------------------------------
# One-time parameter layout preparation (run OUTSIDE the jitted forward)
# ---------------------------------------------------------------------------

def prepare_params(params, lane_pad=128):
    """Pre-transpose / stack / lane-pad all weights once."""
    num_classes = params["mlp"][-1]["w"].shape[0]
    pad_c = _round_up(max(num_classes, lane_pad), lane_pad)

    gnn_wstack = [
        jnp.concatenate([l["w_self"].T, l["w_neigh"].T], axis=0)    # (2*in, out)
        for l in params["gnn"]
    ]
    mlp_w, mlp_b = [], []
    n_mlp = len(params["mlp"])
    for i, l in enumerate(params["mlp"]):
        w = l["w"].T                       # (in, out)
        b = l["b"].reshape(1, -1)          # (1, out)
        if i == n_mlp - 1 and w.shape[1] != pad_c:
            w = jnp.pad(w, ((0, 0), (0, pad_c - w.shape[1])))
            b = jnp.pad(b, ((0, 0), (0, pad_c - b.shape[1])),
                        constant_values=_NEG_PAD)
        mlp_w.append(w)
        mlp_b.append(b)
    return {"gnn_wstack": gnn_wstack, "mlp_w": mlp_w, "mlp_b": mlp_b}


# ---------------------------------------------------------------------------
# Batched fused forward (single pallas_call for the whole batch)
# ---------------------------------------------------------------------------

def cora_forward(prepped, node_feats, adj_matrix, *, num_classes):
    """node_feats: (B, N, F) or (N, F); adj: (B, N, N) or (N, N) -> (B, N, C)."""
    single = node_feats.ndim == 2
    if single:
        node_feats = node_feats[None]
        adj_matrix = adj_matrix[None]

    B, N, F = node_feats.shape
    gnn_wstack = prepped["gnn_wstack"]
    mlp_w, mlp_b = prepped["mlp_w"], prepped["mlp_b"]
    num_gnn, num_mlp = len(gnn_wstack), len(mlp_w)
    pad_c = mlp_w[-1].shape[1]

    weight_args = list(gnn_wstack)
    for w, b in zip(mlp_w, mlp_b):
        weight_args += [w, b]

    # --- advisory cost estimate so XLA can overlap this tiny kernel
    flops = 0
    for ws in gnn_wstack:
        k2, out = ws.shape
        flops += 2 * N * N * (k2 // 2) + 2 * N * k2 * out
    for w in mlp_w:
        kin, out = w.shape
        flops += 2 * N * kin * out
    flops *= B
    transcendentals = B * N * (pad_c + 1)
    itemsize = jnp.dtype(node_feats.dtype).itemsize
    bytes_accessed = int(
        (node_feats.size + adj_matrix.size + B * N * pad_c) * itemsize
        + sum(int(a.size) * jnp.dtype(a.dtype).itemsize for a in weight_args))

    kernel = functools.partial(_fused_forward_kernel,
                               num_gnn=num_gnn, num_mlp=num_mlp)

    # Per-graph blocks; weights use a constant index_map (kept VMEM-resident
    # across grid steps by the pipeliner).
    # NOTE: for real-Cora N the adj spec should become row-tiled on v7x.
    in_specs = ([pl.BlockSpec((None, N, F), lambda b: (b, 0, 0)),
                 pl.BlockSpec((None, N, N), lambda b: (b, 0, 0))] +
                [pl.BlockSpec(a.shape, lambda b: (0, 0)) for a in weight_args])
    out_specs = pl.BlockSpec((None, N, pad_c), lambda b: (b, 0, 0))

    out_padded = pl.pallas_call(
        kernel,
        out_shape=jax.ShapeDtypeStruct((B, N, pad_c), node_feats.dtype),
        grid=(B,),
        in_specs=in_specs,
        out_specs=out_specs,
        compiler_params=pltpu.CompilerParams(
            dimension_semantics=("parallel",)),
        cost_estimate=pl.CostEstimate(flops=flops,
                                      transcendentals=transcendentals,
                                      bytes_accessed=bytes_accessed),
    )(node_feats, adj_matrix, *weight_args)

    out = out_padded[:, :, :num_classes]
    return out[0] if single else out


# ---------------------------------------------------------------------------
# Pure-JAX reference (mirrors the PyTorch module exactly, one graph)
# ---------------------------------------------------------------------------

def cora_forward_ref(params, x, adj):
    for layer in params["gnn"][:-1]:
        x = jnp.maximum(x @ layer["w_self"].T + (adj @ x) @ layer["w_neigh"].T, 0.0)
    layer = params["gnn"][-1]
    x = x @ layer["w_self"].T + (adj @ x) @ layer["w_neigh"].T
    for layer in params["mlp"][:-1]:
        x = jnp.maximum(x @ layer["w"].T + layer["b"], 0.0)
    layer = params["mlp"][-1]
    x = x @ layer["w"].T + layer["b"]
    return jax.nn.log_softmax(x, axis=-1)


# ---------------------------------------------------------------------------
# Parameter construction (deterministic, synthetic, PyTorch-style shapes)
# ---------------------------------------------------------------------------

def init_params(key, input_dim, num_gnn_layers, num_mlp_layers,
                hidden_features, num_classes):
    params = {"gnn": [], "mlp": []}

    def _lin_w(k, out_d, in_d):
        bound = 1.0 / jnp.sqrt(in_d)
        return jax.random.uniform(k, (out_d, in_d), jnp.float32, -bound, bound)

    def _lin_b(k, out_d, in_d):
        bound = 1.0 / jnp.sqrt(in_d)
        return jax.random.uniform(k, (out_d,), jnp.float32, -bound, bound)

    # GNN: num_gnn_layers hidden GNNLayers (ReLU) + out_layer (no act)
    gnn_dims = [(input_dim, hidden_features)]
    gnn_dims += [(hidden_features, hidden_features)] * (num_gnn_layers - 1)
    gnn_dims += [(hidden_features, hidden_features)]  # out_layer
    for (d_in, d_out) in gnn_dims:
        key, k1, k2 = jax.random.split(key, 3)
        params["gnn"].append({
            "w_self": _lin_w(k1, d_out, d_in),
            "w_neigh": _lin_w(k2, d_out, d_in),
        })

    # MLP: Linear(hidden, hidden) + (num_mlp_layers-2) hidden + Linear(hidden, classes)
    mlp_dims = [(hidden_features, hidden_features)]
    mlp_dims += [(hidden_features, hidden_features)] * (num_mlp_layers - 2)
    mlp_dims += [(hidden_features, num_classes)]
    for (d_in, d_out) in mlp_dims:
        key, k1, k2 = jax.random.split(key, 3)
        params["mlp"].append({
            "w": _lin_w(k1, d_out, d_in),
            "b": _lin_b(k2, d_out, d_in),
        })
    return params


# ---------------------------------------------------------------------------
# Main
# ---------------------------------------------------------------------------

if __name__ == "__main__":
    B = 4                # graphs per batched pallas_call
    N = 128              # nodes per graph
    INPUT_DIM = 64       # input feature dim
    HIDDEN = 32          # hidden features
    NUM_CLASSES = 8      # classes
    NUM_GNN_LAYERS = 2
    NUM_MLP_LAYERS = 2

    key = jax.random.PRNGKey(0)
    key, kx, ka = jax.random.split(key, 3)

    node_feats = jax.random.normal(kx, (B, N, INPUT_DIM), jnp.float32)
    # symmetric 0/1 adjacency with self-loops, row-sum normalized, per graph
    adj_raw = (jax.random.uniform(ka, (B, N, N)) < 0.05).astype(jnp.float32)
    eye = jnp.eye(N, dtype=jnp.float32)[None]
    adj = jnp.clip(adj_raw + jnp.swapaxes(adj_raw, 1, 2) + eye, 0.0, 1.0)
    adj = adj / jnp.sum(adj, axis=2, keepdims=True)

    params = init_params(key, INPUT_DIM, NUM_GNN_LAYERS, NUM_MLP_LAYERS,
                         HIDDEN, NUM_CLASSES)

    # One-time weight layout prep (outside the jitted forward).
    prepped = prepare_params(params)

    fwd = jax.jit(functools.partial(cora_forward, num_classes=NUM_CLASSES))
    out = jax.block_until_ready(fwd(prepped, node_feats, adj))

    assert out.shape == (B, N, NUM_CLASSES), out.shape
    # sanity: log_softmax rows should exponentiate-sum to ~1
    row_sums = jnp.sum(jnp.exp(out), axis=-1)
    assert jnp.allclose(row_sums, 1.0, atol=1e-4), row_sums
    # correctness vs pure-JAX reference (vmapped over graphs)
    ref = jax.jit(jax.vmap(cora_forward_ref, in_axes=(None, 0, 0)))(
        params, node_feats, adj)
    err = jnp.max(jnp.abs(out - ref))
    assert jnp.allclose(out, ref, atol=1e-4, rtol=1e-4), err

    print("KERNEL_OK")
</pallas_src>

<mosaic_0001>
module attributes {stable_mosaic.version = 11 : i64} {
  func.func @_fused_forward_kernel(%arg0: i32, %arg1: memref<1x128x64xf32, #tpu.memory_space<vmem>>, %arg2: memref<1x128x128xf32, #tpu.memory_space<vmem>>, %arg3: memref<128x32xf32, #tpu.memory_space<vmem>>, %arg4: memref<64x32xf32, #tpu.memory_space<vmem>>, %arg5: memref<64x32xf32, #tpu.memory_space<vmem>>, %arg6: memref<32x32xf32, #tpu.memory_space<vmem>>, %arg7: memref<1x32xf32, #tpu.memory_space<vmem>>, %arg8: memref<32x128xf32, #tpu.memory_space<vmem>>, %arg9: memref<1x128xf32, #tpu.memory_space<vmem>>, %arg10: memref<1x128x128xf32, #tpu.memory_space<vmem>>) attributes {dimension_semantics = [#tpu.dimension_semantics<parallel>], iteration_bounds = array<i64: 4>, scalar_prefetch = 0 : i64, scratch_operands = 0 : i64, tpu.core_type = #tpu.core_type<tc>, window_params = [{transform_indices = @transform_0, window_bounds = array<i64: 1, 128, 64>}, {transform_indices = @transform_1, window_bounds = array<i64: 1, 128, 128>}, {pipeline_mode = #tpu.pipeline_mode<synchronous>, transform_indices = @transform_2, window_bounds = array<i64: 128, 32>}, {pipeline_mode = #tpu.pipeline_mode<synchronous>, transform_indices = @transform_3, window_bounds = array<i64: 64, 32>}, {pipeline_mode = #tpu.pipeline_mode<synchronous>, transform_indices = @transform_4, window_bounds = array<i64: 64, 32>}, {pipeline_mode = #tpu.pipeline_mode<synchronous>, transform_indices = @transform_5, window_bounds = array<i64: 32, 32>}, {pipeline_mode = #tpu.pipeline_mode<synchronous>, transform_indices = @transform_6, window_bounds = array<i64: 1, 32>}, {pipeline_mode = #tpu.pipeline_mode<synchronous>, transform_indices = @transform_7, window_bounds = array<i64: 32, 128>}, {pipeline_mode = #tpu.pipeline_mode<synchronous>, transform_indices = @transform_8, window_bounds = array<i64: 1, 128>}, {transform_indices = @transform_9, window_bounds = array<i64: 1, 128, 128>}]} {
    %c0 = arith.constant 0 : index
    %c0_0 = arith.constant 0 : index
    %c0_1 = arith.constant 0 : index
    %0 = vector.load %arg1[%c0, %c0_0, %c0_1] : memref<1x128x64xf32, #tpu.memory_space<vmem>>, vector<1x128x64xf32>
    %1 = vector.shape_cast %0 : vector<1x128x64xf32> to vector<128x64xf32>
    %c0_2 = arith.constant 0 : index
    %c0_3 = arith.constant 0 : index
    %c0_4 = arith.constant 0 : index
    %2 = vector.load %arg2[%c0_2, %c0_3, %c0_4] : memref<1x128x128xf32, #tpu.memory_space<vmem>>, vector<1x128x128xf32>
    %3 = vector.shape_cast %2 : vector<1x128x128xf32> to vector<128x128xf32>
    %c0_5 = arith.constant 0 : index
    %c0_6 = arith.constant 0 : index
    %4 = vector.load %arg3[%c0_5, %c0_6] : memref<128x32xf32, #tpu.memory_space<vmem>>, vector<128x32xf32>
    %cst = arith.constant dense<0.000000e+00> : vector<128x64xf32>
    %5 = tpu.matmul %3, %1, %cst {dimension_numbers = #tpu.dot_dimension_numbers<[1], [0], [0], [1], [0, 0, 1, 1], [], []>} : vector<128x128xf32>, vector<128x64xf32>, vector<128x64xf32> -> vector<128x64xf32>
    %6 = tpu.concatenate %1, %5 in 1 : vector<128x64xf32>, vector<128x64xf32> -> vector<128x128xf32>
    %cst_7 = arith.constant dense<0.000000e+00> : vector<128x32xf32>
    %7 = tpu.matmul %6, %4, %cst_7 {dimension_numbers = #tpu.dot_dimension_numbers<[1], [0], [0], [1], [0, 0, 1, 1], [], []>} : vector<128x128xf32>, vector<128x32xf32>, vector<128x32xf32> -> vector<128x32xf32>
    %cst_8 = arith.constant 0.000000e+00 : f32
    %8 = vector.broadcast %cst_8 : f32 to vector<128x32xf32>
    %9 = arith.maximumf %7, %8 : vector<128x32xf32>
    %c0_9 = arith.constant 0 : index
    %c0_10 = arith.constant 0 : index
    %10 = vector.load %arg4[%c0_9, %c0_10] : memref<64x32xf32, #tpu.memory_space<vmem>>, vector<64x32xf32>
    %cst_11 = arith.constant dense<0.000000e+00> : vector<128x32xf32>
    %11 = tpu.matmul %3, %9, %cst_11 {dimension_numbers = #tpu.dot_dimension_numbers<[1], [0], [0], [1], [0, 0, 1, 1], [], []>} : vector<128x128xf32>, vector<128x32xf32>, vector<128x32xf32> -> vector<128x32xf32>
    %12 = tpu.concatenate %9, %11 in 1 : vector<128x32xf32>, vector<128x32xf32> -> vector<128x64xf32>
    %cst_12 = arith.constant dense<0.000000e+00> : vector<128x32xf32>
    %13 = tpu.matmul %12, %10, %cst_12 {dimension_numbers = #tpu.dot_dimension_numbers<[1], [0], [0], [1], [0, 0, 1, 1], [], []>} : vector<128x64xf32>, vector<64x32xf32>, vector<128x32xf32> -> vector<128x32xf32>
    %cst_13 = arith.constant 0.000000e+00 : f32
    %14 = vector.broadcast %cst_13 : f32 to vector<128x32xf32>
    %15 = arith.maximumf %13, %14 : vector<128x32xf32>
    %c0_14 = arith.constant 0 : index
    %c0_15 = arith.constant 0 : index
    %16 = vector.load %arg5[%c0_14, %c0_15] : memref<64x32xf32, #tpu.memory_space<vmem>>, vector<64x32xf32>
    %cst_16 = arith.constant dense<0.000000e+00> : vector<128x32xf32>
    %17 = tpu.matmul %3, %15, %cst_16 {dimension_numbers = #tpu.dot_dimension_numbers<[1], [0], [0], [1], [0, 0, 1, 1], [], []>} : vector<128x128xf32>, vector<128x32xf32>, vector<128x32xf32> -> vector<128x32xf32>
    %18 = tpu.concatenate %15, %17 in 1 : vector<128x32xf32>, vector<128x32xf32> -> vector<128x64xf32>
    %cst_17 = arith.constant dense<0.000000e+00> : vector<128x32xf32>
    %19 = tpu.matmul %18, %16, %cst_17 {dimension_numbers = #tpu.dot_dimension_numbers<[1], [0], [0], [1], [0, 0, 1, 1], [], []>} : vector<128x64xf32>, vector<64x32xf32>, vector<128x32xf32> -> vector<128x32xf32>
    %c0_18 = arith.constant 0 : index
    %c0_19 = arith.constant 0 : index
    %20 = vector.load %arg6[%c0_18, %c0_19] : memref<32x32xf32, #tpu.memory_space<vmem>>, vector<32x32xf32>
    %c0_20 = arith.constant 0 : index
    %c0_21 = arith.constant 0 : index
    %21 = vector.load %arg7[%c0_20, %c0_21] : memref<1x32xf32, #tpu.memory_space<vmem>>, vector<1x32xf32>
    %cst_22 = arith.constant dense<0.000000e+00> : vector<128x32xf32>
    %22 = tpu.matmul %19, %20, %cst_22 {dimension_numbers = #tpu.dot_dimension_numbers<[1], [0], [0], [1], [0, 0, 1, 1], [], []>} : vector<128x32xf32>, vector<32x32xf32>, vector<128x32xf32> -> vector<128x32xf32>
    %23 = vector.broadcast %21 : vector<1x32xf32> to vector<128x32xf32>
    %24 = arith.addf %22, %23 : vector<128x32xf32>
    %cst_23 = arith.constant 0.000000e+00 : f32
    %25 = vector.broadcast %cst_23 : f32 to vector<128x32xf32>
    %26 = arith.maximumf %24, %25 : vector<128x32xf32>
    %c0_24 = arith.constant 0 : index
    %c0_25 = arith.constant 0 : index
    %27 = vector.load %arg8[%c0_24, %c0_25] : memref<32x128xf32, #tpu.memory_space<vmem>>, vector<32x128xf32>
    %c0_26 = arith.constant 0 : index
    %c0_27 = arith.constant 0 : index
    %28 = vector.load %arg9[%c0_26, %c0_27] : memref<1x128xf32, #tpu.memory_space<vmem>>, vector<1x128xf32>
    %cst_28 = arith.constant dense<0.000000e+00> : vector<128x128xf32>
    %29 = tpu.matmul %26, %27, %cst_28 {dimension_numbers = #tpu.dot_dimension_numbers<[1], [0], [0], [1], [0, 0, 1, 1], [], []>} : vector<128x32xf32>, vector<32x128xf32>, vector<128x128xf32> -> vector<128x128xf32>
    %30 = vector.broadcast %28 : vector<1x128xf32> to vector<128x128xf32>
    %31 = arith.addf %29, %30 : vector<128x128xf32>
    %cst_29 = arith.constant dense<0xFF800000> : vector<128xf32>
    %32 = vector.multi_reduction <maximumf>, %31, %cst_29 [1] : vector<128x128xf32> to vector<128xf32>
    %33 = vector.shape_cast %32 : vector<128xf32> to vector<128x1xf32>
    %34 = vector.broadcast %33 : vector<128x1xf32> to vector<128x128xf32>
    %35 = arith.subf %31, %34 : vector<128x128xf32>
    %36 = math.exp %35 : vector<128x128xf32>
    %cst_30 = arith.constant dense<0.000000e+00> : vector<128xf32>
    %37 = vector.multi_reduction <add>, %36, %cst_30 [1] : vector<128x128xf32> to vector<128xf32>
    %38 = vector.shape_cast %37 : vector<128xf32> to vector<128x1xf32>
    %39 = math.log %38 : vector<128x1xf32>
    %40 = vector.broadcast %39 : vector<128x1xf32> to vector<128x128xf32>
    %41 = arith.subf %35, %40 : vector<128x128xf32>
    %c0_31 = arith.constant 0 : index
    %c0_32 = arith.constant 0 : index
    %c0_33 = arith.constant 0 : index
    %42 = vector.load %arg10[%c0_31, %c0_32, %c0_33] : memref<1x128x128xf32, #tpu.memory_space<vmem>>, vector<1x128x128xf32>
    %43 = vector.shape_cast %42 : vector<1x128x128xf32> to vector<128x128xf32>
    %44 = vector.shape_cast %41 : vector<128x128xf32> to vector<1x128x128xf32>
    tpu.vector_store %arg10[%c0_31, %c0_32, %c0_33], %44 {strides = array<i32>} : memref<1x128x128xf32, #tpu.memory_space<vmem>>, vector<1x128x128xf32>,
    return
  }
  func.func @transform_0(%arg0: i32) -> (i32, i32, i32) {
    %c0_i32 = arith.constant 0 : i32
    %c0_i32_0 = arith.constant 0 : i32
    %c0_i32_1 = arith.constant 0 : i32
    return %arg0, %c0_i32, %c0_i32_0 : i32, i32, i32
  }
  func.func @transform_1(%arg0: i32) -> (i32, i32, i32) {
    %c0_i32 = arith.constant 0 : i32
    %c0_i32_0 = arith.constant 0 : i32
    %c0_i32_1 = arith.constant 0 : i32
    return %arg0, %c0_i32, %c0_i32_0 : i32, i32, i32
  }
  func.func @transform_2(%arg0: i32) -> (i32, i32) {
    %c0_i32 = arith.constant 0 : i32
    %c0_i32_0 = arith.constant 0 : i32
    %c0_i32_1 = arith.constant 0 : i32
    return %c0_i32, %c0_i32_0 : i32, i32
  }
  func.func @transform_3(%arg0: i32) -> (i32, i32) {
    %c0_i32 = arith.constant 0 : i32
    %c0_i32_0 = arith.constant 0 : i32
    %c0_i32_1 = arith.constant 0 : i32
    return %c0_i32, %c0_i32_0 : i32, i32
  }
  func.func @transform_4(%arg0: i32) -> (i32, i32) {
    %c0_i32 = arith.constant 0 : i32
    %c0_i32_0 = arith.constant 0 : i32
    %c0_i32_1 = arith.constant 0 : i32
    return %c0_i32, %c0_i32_0 : i32, i32
  }
  func.func @transform_5(%arg0: i32) -> (i32, i32) {
    %c0_i32 = arith.constant 0 : i32
    %c0_i32_0 = arith.constant 0 : i32
    %c0_i32_1 = arith.constant 0 : i32
    return %c0_i32, %c0_i32_0 : i32, i32
  }
  func.func @transform_6(%arg0: i32) -> (i32, i32) {
    %c0_i32 = arith.constant 0 : i32
    %c0_i32_0 = arith.constant 0 : i32
    %c0_i32_1 = arith.constant 0 : i32
    return %c0_i32, %c0_i32_0 : i32, i32
  }
  func.func @transform_7(%arg0: i32) -> (i32, i32) {
    %c0_i32 = arith.constant 0 : i32
    %c0_i32_0 = arith.constant 0 : i32
    %c0_i32_1 = arith.constant 0 : i32
    return %c0_i32, %c0_i32_0 : i32, i32
  }
  func.func @transform_8(%arg0: i32) -> (i32, i32) {
    %c0_i32 = arith.constant 0 : i32
    %c0_i32_0 = arith.constant 0 : i32
    %c0_i32_1 = arith.constant 0 : i32
    return %c0_i32, %c0_i32_0 : i32, i32
  }
  func.func @transform_9(%arg0: i32) -> (i32, i32, i32) {
    %c0_i32 = arith.constant 0 : i32
    %c0_i32_0 = arith.constant 0 : i32
    %c0_i32_1 = arith.constant 0 : i32
    return %arg0, %c0_i32, %c0_i32_0 : i32, i32, i32
  }
}

</mosaic_0001>

<bundles_post_ra>
// kernel: cora_forward.1
= control target key start
LH: loop header
LB: loop body
LE: loop exit
PB: predicated region body
PF: predicated region fallthrough
CT: control target
= control target key end

     0   :  { %s3340_s30 = smov 0   ;;  %s4137_s0 = inlined_call_operand.vmem [shape: f32[4,128,64], index: 0, kind: input, shape index: {}]   ;;  %s4138_s1 = inlined_call_operand.vmem [shape: f32[4,128,128], index: 1, kind: input, shape index: {}]   ;;  %s4139_s2 = inlined_call_operand.vmem [shape: f32[128,32], index: 2, kind: input, shape index: {}]   ;;  %s4140_s3 = inlined_call_operand.vmem [shape: f32[64,32], index: 3, kind: input, shape index: {}]   ;;  %s4141_s4 = inlined_call_operand.vmem [shape: f32[64,32], index: 4, kind: input, shape index: {}]   ;;  %s4142_s5 = inlined_call_operand.vmem [shape: f32[32,32], index: 5, kind: input, shape index: {}]   ;;  %s4143_s6 = inlined_call_operand.vmem [shape: f32[1,32], index: 6, kind: input, shape index: {}]   ;;  %s4144_s7 = inlined_call_operand.vmem [shape: f32[32,128], index: 7, kind: input, shape index: {}]   ;;  %s4145_s8 = inlined_call_operand.vmem [shape: f32[1,128], index: 8, kind: input, shape index: {}]   ;;  %s4146_s9 = inlined_call_operand.vmem [shape: f32[4,128,128], index: 9, kind: output, shape index: {}]  }
   0x1 LB: > { %s2324_s10 = sadd.s32 4294967295, %s3286_s30   ;;  %p2328_p0 = scmp.ge.s32.totalorder %s3286_s30, 1  ;;  %s3286_s30 = sphi %s3340_s30, %s19_s30  }
   0x2   : > { %p297_p1 = scmp.lt.s32.totalorder %s3286_s30, 5 }
   0x4   : > { %p298_p2 = pnand %p2328_p0, %p297_p1 }
   0x5   : > { %p338_p3 = scmp.lt.s32.totalorder (!%p298_p2), %s2324_s10, 3  ;;  %v385_v40 = vld [vmem:[%s4139_s2] sm:$0xff] (!%p298_p2)  ;;  %v386_v41 = vld [vmem:[%s4139_s2 + $0x8] sm:$0xff] (!%p298_p2)  ;;  %v387_v42 = vld [vmem:[%s4139_s2 + $0x10] sm:$0xff] (!%p298_p2)  ;;  %s3288_s12 = smov (!%p298_p2), 64   ;;  %vm610_vm0 = vcmask (!%p298_p2), 523264  }
   0x6   : > { %301 = sbr.rel (%p298_p2) target bundleno = 2539 (0x9eb), region = 56  ;;  %v3022_v43 = vpack.c.bf16 (!%p298_p2), %v386_v41, %v385_v40  ;;  %v388_v44 = vld [vmem:[%s4139_s2 + $0x18] sm:$0xff] (!%p298_p2)  ;;  %v389_v46 = vld [vmem:[%s4139_s2 + $0x20] sm:$0xff] (!%p298_p2)  ;;  %v390_v47 = vld [vmem:[%s4139_s2 + $0x28] sm:$0xff] (!%p298_p2)  ;;  %s3289_s29 = smov (!%p298_p2), 32   ;;  %vm1005_vm1 = vcmask (!%p298_p2), 261120  }
   0x7   : > { %v3026_v45 = vpack.c.bf16 (!%p298_p2), %v388_v44, %v387_v42  ;;  %v3030_v48 = vpack.c.bf16 (!%p298_p2), %v390_v47, %v389_v46  ;;  %v391_v49 = vld [vmem:[%s4139_s2 + $0x30] sm:$0xff] (!%p298_p2)  ;;  %v392_v50 = vld [vmem:[%s4139_s2 + $0x38] sm:$0xff] (!%p298_p2)  ;;  %v393_v52 = vld [vmem:[%s4139_s2 + $0x40] sm:$0xff] (!%p298_p2) }
   0x8   : > { %3023 = vmatprep.subr.bf16.mxu1 (!%p298_p2), %v3022_v43  ;;  %v3034_v51 = vpack.c.bf16 (!%p298_p2), %v392_v50, %v391_v49  ;;  %v394_v53 = vld [vmem:[%s4139_s2 + $0x48] sm:$0xff] (!%p298_p2)  ;;  %v395_v55 = vld [vmem:[%s4139_s2 + $0x50] sm:$0xff] (!%p298_p2)  ;;  %v396_v56 = vld [vmem:[%s4139_s2 + $0x58] sm:$0xff] (!%p298_p2) }
   0x9   : > { %3025 = vmatpush3.bf16.msra.mxu1 (!%p298_p2), %v3022_v43  ;;  %v3038_v54 = vpack.c.bf16 (!%p298_p2), %v394_v53, %v393_v52  ;;  %v3042_v57 = vpack.c.bf16 (!%p298_p2), %v396_v56, %v395_v55  ;;  %v397_v58 = vld [vmem:[%s4139_s2 + $0x60] sm:$0xff] (!%p298_p2)  ;;  %v398_v59 = vld [vmem:[%s4139_s2 + $0x68] sm:$0xff] (!%p298_p2)  ;;  %v399_v61 = vld [vmem:[%s4139_s2 + $0x70] sm:$0xff] (!%p298_p2) }
   0xa   : > { %3027 = vmatprep.subr.bf16.mxu1 (!%p298_p2), %v3026_v45  ;;  %v3046_v60 = vpack.c.bf16 (!%p298_p2), %v398_v59, %v397_v58  ;;  %v400_v62 = vld [vmem:[%s4139_s2 + $0x78] sm:$0xff] (!%p298_p2) }
   0xb   : > { %v3050_v63 = vpack.c.bf16 (!%p298_p2), %v400_v62, %v399_v61 }
   0xd   : > { %s4148_s10 = smov (!%p338_p3, %s2324_s10), 3  ;;  %3029 = vmatpush3.bf16.msra.mxu1 %v3026_v45 }
   0xe   : > { %s3348_s11 = sshll.u32 %s4148_s10, 7  ;;  %3031 = vmatprep.subr.bf16.mxu1 %v3030_v48 }
   0xf   : > { %s3354_s14 = scalar_lea.vmem %s4137_s0, %s3348_s11  ;;  %s3382_s17 = scalar_lea.vmem %s4138_s1, %s3348_s11 }
  0x10   : > { %v3357_v0 = vld [vmem:[%s3354_s14] sm:$0xff]  ;;  %v3360_v1 = vld [vmem:[%s3354_s14 + $0x8] sm:$0xff]  ;;  %v3363_v2 = vld [vmem:[%s3354_s14 + $0x10] sm:$0xff] }
  0x11   : > { %v2990_v3 = vpack.c.bf16 %v3360_v1, %v3357_v0  ;;  %v3368_v4 = vld [vmem:[%s3354_s14 + $0x18] sm:$0xff]  ;;  %v3373_v6 = vld [vmem:[%s3354_s14 + $0x20] sm:$0xff]  ;;  %v3376_v7 = vld [vmem:[%s3354_s14 + $0x28] sm:$0xff]  ;;  %3033 = vmatpush3.bf16.msra.mxu1 %v3030_v48 }
  0x12   : > { %v2994_v5 = vpack.c.bf16 %v3368_v4, %v3363_v2  ;;  %v2998_v8 = vpack.c.bf16 %v3376_v7, %v3373_v6  ;;  %v3387_v9 = vld [vmem:[%s3382_s17] sm:$0xff]  ;;  %v3390_v10 = vld [vmem:[%s3354_s14 + $0x30] sm:$0xff]  ;;  %v3393_v11 = vld [vmem:[%s3354_s14 + $0x38] sm:$0xff]  ;;  %3035 = vmatprep.subr.bf16.mxu1 %v3034_v51 }
  0x13   : > { %2991 = vmatprep.subr.bf16.mxu0 %v2990_v3  ;;  %2654 = vmatprep.mubr.f32.mxu0 %v3387_v9  ;;  %v3002_v12 = vpack.c.bf16 %v3393_v11, %v3390_v10  ;;  %v3399_v13 = vld [vmem:[%s3354_s14 + $0x40] sm:$0xff]  ;;  %v3402_v14 = vld [vmem:[%s3354_s14 + $0x48] sm:$0xff]  ;;  %v3407_v16 = vld [vmem:[%s3354_s14 + $0x50] sm:$0xff] }
  0x14   : > { %2993 = vmatpush3.bf16.msra.mxu0 %v2990_v3  ;;  %v3006_v15 = vpack.c.bf16 %v3402_v14, %v3399_v13  ;;  %v3410_v17 = vld [vmem:[%s3354_s14 + $0x58] sm:$0xff]  ;;  %v3415_v19 = vld [vmem:[%s3354_s14 + $0x60] sm:$0xff]  ;;  %v3418_v20 = vld [vmem:[%s3354_s14 + $0x68] sm:$0xff] }
  0x15   : > { %2995 = vmatprep.subr.bf16.mxu0 %v2994_v5  ;;  %v3010_v18 = vpack.c.bf16 %v3410_v17, %v3407_v16  ;;  %v3014_v21 = vpack.c.bf16 %v3418_v20, %v3415_v19  ;;  %v3423_v22 = vld [vmem:[%s3354_s14 + $0x70] sm:$0xff]  ;;  %v3426_v23 = vld [vmem:[%s3354_s14 + $0x78] sm:$0xff]  ;;  %v3431_v25 = vld [vmem:[%s3382_s17 + $0x8] sm:$0xff]  ;;  %3037 = vmatpush3.bf16.msra.mxu1 %v3034_v51 }
  0x16   : > { %v3018_v24 = vpack.c.bf16 %v3426_v23, %v3423_v22  ;;  %v3434_v26 = vld [vmem:[%s3382_s17 + $0x10] sm:$0xff]  ;;  %v3439_v27 = vld [vmem:[%s3382_s17 + $0x18] sm:$0xff]  ;;  %v3442_v28 = vld [vmem:[%s3382_s17 + $0x20] sm:$0xff]  ;;  %3039 = vmatprep.subr.bf16.mxu1 %v3038_v54 }
  0x17   : > { %v3447_v29 = vld [vmem:[%s3382_s17 + $0x28] sm:$0xff]  ;;  %v3450_v30 = vld [vmem:[%s3382_s17 + $0x30] sm:$0xff]  ;;  %v3455_v31 = vld [vmem:[%s3382_s17 + $0x38] sm:$0xff] }
  0x18   : > { %2997 = vmatpush3.bf16.msra.mxu0 %v2994_v5  ;;  %v3458_v32 = vld [vmem:[%s3382_s17 + $0x40] sm:$0xff]  ;;  %v3463_v33 = vld [vmem:[%s3382_s17 + $0x48] sm:$0xff]  ;;  %v3466_v34 = vld [vmem:[%s3382_s17 + $0x50] sm:$0xff] }
  0x19   : > { %2999 = vmatprep.subr.bf16.mxu0 %v2998_v8  ;;  %v3471_v35 = vld [vmem:[%s3382_s17 + $0x58] sm:$0xff]  ;;  %v3474_v36 = vld [vmem:[%s3382_s17 + $0x60] sm:$0xff]  ;;  %v3479_v37 = vld [vmem:[%s3382_s17 + $0x68] sm:$0xff]  ;;  %3041 = vmatpush3.bf16.msra.mxu1 %v3038_v54 }
  0x1a   : > { %v3482_v38 = vld [vmem:[%s3382_s17 + $0x70] sm:$0xff]  ;;  %v3487_v39 = vld [vmem:[%s3382_s17 + $0x78] sm:$0xff]  ;;  %3043 = vmatprep.subr.bf16.mxu1 %v3042_v57 }
  0x1c   : > { %3001 = vmatpush3.bf16.msra.mxu0 %v2998_v8 }
  0x1d   : > { %3003 = vmatprep.subr.bf16.mxu0 %v3002_v12  ;;  %3045 = vmatpush3.bf16.msra.mxu1 %v3042_v57 }
  0x1e   : > { %3047 = vmatprep.subr.bf16.mxu1 %v3046_v60 }
  0x20   : > { %3005 = vmatpush3.bf16.msra.mxu0 %v3002_v12 }
  0x21   : > { %3007 = vmatprep.subr.bf16.mxu0 %v3006_v15  ;;  %3049 = vmatpush3.bf16.msra.mxu1 %v3046_v60 }
  0x22   : > { %3051 = vmatprep.subr.bf16.mxu1 %v3050_v63 }
  0x24   : > { %3009 = vmatpush3.bf16.msra.mxu0 %v3006_v15 }
  0x25   : > { %3011 = vmatprep.subr.bf16.mxu0 %v3010_v18  ;;  %3053 = vmatpush3.bf16.msra.mxu1 %v3050_v63 }
  0x28   : > { %3013 = vmatpush3.bf16.msra.mxu0 %v3010_v18 }
  0x29   : > { %3015 = vmatprep.subr.bf16.mxu0 %v3014_v21 }
  0x2c   : > { %3017 = vmatpush3.bf16.msra.mxu0 %v3014_v21 }
  0x2d   : > { %3019 = vmatprep.subr.bf16.mxu0 %v3018_v24 }
  0x30   : > { %3021 = vmatpush3.bf16.msra.mxu0 %v3018_v24 }
  0x33   : > { %2655 = vmatmul.mubr.f32.vlgmr.msra.gmra.mrb[0].mxu0 %v3431_v25 }
  0x34   : > { %2657 = vmatprep.mubr.f32.mxu0 %v3434_v26 }
  0x37   : > { %2658 = vmatmul.mubr.f32.gmra.mrb[2].mxu0 %v3439_v27 }
  0x38   : > { %2660 = vmatprep.mubr.f32.mxu0 %v3442_v28 }
  0x3b   : > { %2661 = vmatmul.mubr.f32.gmra.mrb[4].mxu0 %v3447_v29 }
  0x3c   : > { %2663 = vmatprep.mubr.f32.mxu0 %v3450_v30 }
  0x3f   : > { %2664 = vmatmul.mubr.f32.gmra.mrb[6].mxu0 %v3455_v31 }
  0x40   : > { %2666 = vmatprep.mubr.f32.mxu0 %v3458_v32 }
  0x43   : > { %2667 = vmatmul.mubr.f32.gmra.mrb[8].mxu0 %v3463_v33 }
  0x44   : > { %2669 = vmatprep.mubr.f32.mxu0 %v3466_v34 }
  0x47   : > { %2670 = vmatmul.mubr.f32.gmra.mrb[10].mxu0 %v3471_v35 }
  0x48   : > { %2672 = vmatprep.mubr.f32.mxu0 %v3474_v36 }
  0x4b   : > { %2673 = vmatmul.mubr.f32.gmra.mrb[12].mxu0 %v3479_v37 }
  0x4c   : > { %2675 = vmatprep.mubr.f32.mxu0 %v3482_v38 }
  0x4f   : > { %2676 = vmatmul.mubr.f32.gmra.mrb[14].mxu0 %v3487_v39 }
  0x50   : > { %2766 = vmatprep.mubr.f32.mxu0 %v3387_v9 }
 0x106   : > { %v2656_v3 = vpop.f32.mrb[0].mxu0 }
 0x107   : > { %v467_v5 = vpop.f32.mrb[1].mxu0 }
 0x108   : > { %v3176_v8 = vpack.i.bf16 %v2656_v3, %v467_v5 }
 0x10a   : > { %3177 = vrot.lane.b32.xlu0 %v3176_v8, %s3288_s12  ;;  %v2659_v12 = vpop.f32.mrb[2].mxu0 }
 0x10b   : > { %v477_v15 = vpop.f32.mrb[3].mxu0 }
 0x10c   : > { %v3181_v18 = vpack.i.bf16 %v2659_v12, %v477_v15 }
 0x10e   : > { %3182 = vrot.lane.b32.xlu0 %v3181_v18, %s3288_s12  ;;  %v2662_v21 = vpop.f32.mrb[4].mxu0 }
 0x10f   : > { %v487_v24 = vpop.f32.mrb[5].mxu0 }
 0x110   : > { %v3186_v40 = vpack.i.bf16 %v2662_v21, %v487_v24 }
 0x112   : > { %3187 = vrot.lane.b32.xlu1 %v3186_v40, %s3288_s12  ;;  %v2665_v41 = vpop.f32.mrb[6].mxu0 }
 0x113   : > { %v497_v42 = vpop.f32.mrb[7].mxu0 }
 0x114   : > { %v3191_v43 = vpack.i.bf16 %v2665_v41, %v497_v42 }
 0x116   : > { %3192 = vrot.lane.b32.xlu1 %v3191_v43, %s3288_s12  ;;  %v2668_v44 = vpop.f32.mrb[8].mxu0 }
 0x117   : > { %v507_v45 = vpop.f32.mrb[9].mxu0 }
 0x118   : > { %v3196_v46 = vpack.i.bf16 %v2668_v44, %v507_v45 }
 0x11a   : > { %3197 = vrot.lane.b32.xlu0 %v3196_v46, %s3288_s12  ;;  %v2671_v47 = vpop.f32.mrb[10].mxu0 }
 0x11b   : > { %v517_v48 = vpop.f32.mrb[11].mxu0 }
 0x11c   : > { %v3201_v49 = vpack.i.bf16 %v2671_v47, %v517_v48 }
 0x11e   : > { %3202 = vrot.lane.b32.xlu1 %v3201_v49, %s3288_s12  ;;  %v2674_v50 = vpop.f32.mrb[12].mxu0 }
 0x11f   : > { %v527_v51 = vpop.f32.mrb[13].mxu0 }
 0x120   : > { %v3206_v52 = vpack.i.bf16 %v2674_v50, %v527_v51 }
 0x122   : > { %3207 = vrot.lane.b32.xlu0 %v3206_v52, %s3288_s12  ;;  %v2677_v53 = vpop.f32.mrb[14].mxu0 }
 0x123   : > { %v537_v54 = vpop.f32.mrb[15].mxu0 }
 0x124   : > { %v3211_v55 = vpack.i.bf16 %v2677_v53, %v537_v54 }
 0x126   : > { %3212 = vrot.lane.b32.xlu1 %v3211_v55, %s3288_s12  ;;  %s4100_s12 = scalar_lea.vmem %s4146_s9, %s3348_s11 }
 0x17c   : > { %v3178_v56 = vpop.permute.xlu0 %3177 }
 0x17d   : > { %v3180_v57 = vunpack.i.h.bf16 %v3178_v56  ;;  %v3179_v58 = vunpack.i.l.bf16 %v3178_v56 }
 0x17f   : > { %v611_v59 = vsel %vm610_vm0, %v3357_v0, %v3179_v58  ;;  %v612_v60 = vsel %vm610_vm0, %v3360_v1, %v3180_v57 }
 0x180   : > { %2710 = vmatprep.mubr.f32.mxu1 %v611_v59  ;;  %v3183_v61 = vpop.permute.xlu0 %3182 }
 0x181   : > { %v3185_v62 = vunpack.i.h.bf16 %v3183_v61  ;;  %v3184_v63 = vunpack.i.l.bf16 %v3183_v61  ;;  %2711 = vmatmul.mubr.f32.vlgmr.msra.gmra.mrb[0].mxu1 %v612_v60 }
 0x183   : > { %v613_v3 = vsel %vm610_vm0, %v3363_v2, %v3184_v63  ;;  %v614_v5 = vsel %vm610_vm0, %v3368_v4, %v3185_v62 }
 0x184   : > { %2713 = vmatprep.mubr.f32.mxu1 %v613_v3  ;;  %v3188_v8 = vpop.permute.xlu1 %3187 }
 0x185   : > { %v3190_v12 = vunpack.i.h.bf16 %v3188_v8  ;;  %v3189_v15 = vunpack.i.l.bf16 %v3188_v8  ;;  %2714 = vmatmul.mubr.f32.gmra.mrb[2].mxu1 %v614_v5 }
 0x187   : > { %v615_v0 = vsel %vm610_vm0, %v3373_v6, %v3189_v15  ;;  %v616_v1 = vsel %vm610_vm0, %v3376_v7, %v3190_v12 }
 0x188   : > { %2716 = vmatprep.mubr.f32.mxu1 %v615_v0  ;;  %v3193_v18 = vpop.permute.xlu1 %3192 }
 0x189   : > { %v3195_v21 = vunpack.i.h.bf16 %v3193_v18  ;;  %v3194_v24 = vunpack.i.l.bf16 %v3193_v18  ;;  %2717 = vmatmul.mubr.f32.gmra.mrb[4].mxu1 %v616_v1 }
 0x18b   : > { %v617_v2 = vsel %vm610_vm0, %v3390_v10, %v3194_v24  ;;  %v618_v4 = vsel %vm610_vm0, %v3393_v11, %v3195_v21 }
 0x18c   : > { %2719 = vmatprep.mubr.f32.mxu1 %v617_v2  ;;  %v3198_v40 = vpop.permute.xlu0 %3197 }
 0x18d   : > { %v3200_v41 = vunpack.i.h.bf16 %v3198_v40  ;;  %v3199_v42 = vunpack.i.l.bf16 %v3198_v40  ;;  %2720 = vmatmul.mubr.f32.gmra.mrb[6].mxu1 %v618_v4 }
 0x18f   : > { %v619_v6 = vsel %vm610_vm0, %v3399_v13, %v3199_v42  ;;  %v620_v7 = vsel %vm610_vm0, %v3402_v14, %v3200_v41 }
 0x190   : > { %2722 = vmatprep.mubr.f32.mxu1 %v619_v6  ;;  %v3203_v43 = vpop.permute.xlu1 %3202 }
 0x191   : > { %v3205_v44 = vunpack.i.h.bf16 %v3203_v43  ;;  %v3204_v45 = vunpack.i.l.bf16 %v3203_v43  ;;  %2723 = vmatmul.mubr.f32.gmra.mrb[8].mxu1 %v620_v7 }
 0x193   : > { %v621_v10 = vsel %vm610_vm0, %v3407_v16, %v3204_v45  ;;  %v622_v11 = vsel %vm610_vm0, %v3410_v17, %v3205_v44 }
 0x194   : > { %2725 = vmatprep.mubr.f32.mxu1 %v621_v10  ;;  %v3208_v46 = vpop.permute.xlu0 %3207 }
 0x195   : > { %v3210_v47 = vunpack.i.h.bf16 %v3208_v46  ;;  %v3209_v48 = vunpack.i.l.bf16 %v3208_v46  ;;  %2726 = vmatmul.mubr.f32.gmra.mrb[10].mxu1 %v622_v11 }
 0x197   : > { %v623_v13 = vsel %vm610_vm0, %v3415_v19, %v3209_v48  ;;  %v624_v14 = vsel %vm610_vm0, %v3418_v20, %v3210_v47  ;;  %v788_v48 = vld [vmem:[%s4140_s3] sm:$0xff] }
 0x198   : > { %2728 = vmatprep.mubr.f32.mxu1 %v623_v13  ;;  %v3213_v49 = vpop.permute.xlu1 %3212  ;;  %v789_v13 = vld [vmem:[%s4140_s3 + $0x8] sm:$0xff] }
 0x199   : > { %v3215_v50 = vunpack.i.h.bf16 %v3213_v49  ;;  %v3214_v51 = vunpack.i.l.bf16 %v3213_v49  ;;  %2729 = vmatmul.mubr.f32.gmra.mrb[12].mxu1 %v624_v14  ;;  %v790_v14 = vld [vmem:[%s4140_s3 + $0x10] sm:$0xff]  ;;  %v3086_v49 = vpack.c.bf16 %v789_v13, %v788_v48 }
 0x19b   : > { %v625_v16 = vsel %vm610_vm0, %v3423_v22, %v3214_v51  ;;  %v626_v17 = vsel %vm610_vm0, %v3426_v23, %v3215_v50  ;;  %v791_v50 = vld [vmem:[%s4140_s3 + $0x18] sm:$0xff]  ;;  %3087 = vmatprep.subr.bf16.mxu1 %v3086_v49 }
 0x19c   : > { %2731 = vmatprep.mubr.f32.mxu1 %v625_v16  ;;  %v3090_v51 = vpack.c.bf16 %v791_v50, %v790_v14  ;;  %v793_v16 = vld [vmem:[%s4140_s3 + $0x28] sm:$0xff]  ;;  %3089 = vmatpush3.bf16.msra.mxu1 %v3086_v49 }
 0x19d   : > { %2732 = vmatmul.mubr.f32.gmra.mrb[14].mxu1 %v626_v17 }
 0x19e   : > { %3091 = vmatprep.subr.bf16.mxu1 %v3090_v51 }
 0x1a0   : > { %3093 = vmatpush3.bf16.msra.mxu1 %v3090_v51 }
 0x254   : > { %v3571_v52 = vpop.f32.mrb[0].mxu1 }
 0x255   : > { %v773_v19 = vmax.f32 %v3571_v52, 0.0  ;;  %v3574_v53 = vpop.f32.mrb[1].mxu1 }
 0x256   : > { %v772_v20 = vmax.f32 %v3574_v53, 0.0 }
 0x258   : > { %v3054_v54 = vpack.c.bf16 %v773_v19, %v772_v20  ;;  %v3581_v55 = vpop.f32.mrb[2].mxu1 }
 0x259   : > { %v775_v22 = vmax.f32 %v3581_v55, 0.0  ;;  %v3584_v23 = vpop.f32.mrb[3].mxu1 }
 0x25a   : > { %v774_v56 = vmax.f32 %v3584_v23, 0.0  ;;  %3055 = vmatprep.subr.bf16.mxu0 %v3054_v54 }
 0x25b   : > { %3057 = vmatpush3.bf16.msra.mxu0 %v3054_v54  ;;  %v794_v54 = vld [vmem:[%s4140_s3 + $0x30] sm:$0xff] }
 0x25c   : > { %v3058_v57 = vpack.c.bf16 %v775_v22, %v774_v56  ;;  %v3591_v58 = vpop.f32.mrb[4].mxu1 }
 0x25d   : > { %v777_v59 = vmax.f32 %v3591_v58, 0.0  ;;  %v3594_v60 = vpop.f32.mrb[5].mxu1 }
 0x25e   : > { %v776_v61 = vmax.f32 %v3594_v60, 0.0  ;;  %3059 = vmatprep.subr.bf16.mxu0 %v3058_v57 }
 0x25f   : > { %3061 = vmatpush3.bf16.msra.mxu0 %v3058_v57  ;;  %v795_v57 = vld [vmem:[%s4140_s3 + $0x38] sm:$0xff] }
 0x260   : > { %v3062_v62 = vpack.c.bf16 %v777_v59, %v776_v61  ;;  %v3601_v63 = vpop.f32.mrb[6].mxu1 }
 0x261   : > { %v779_v3 = vmax.f32 %v3601_v63, 0.0  ;;  %v3604_v5 = vpop.f32.mrb[7].mxu1 }
 0x262   : > { %v778_v8 = vmax.f32 %v3604_v5, 0.0  ;;  %3063 = vmatprep.subr.bf16.mxu0 %v3062_v62 }
 0x263   : > { %3065 = vmatpush3.bf16.msra.mxu0 %v3062_v62  ;;  %v3098_v62 = vpack.c.bf16 %v795_v57, %v794_v54 }
 0x264   : > { %v3066_v12 = vpack.c.bf16 %v779_v3, %v778_v8  ;;  %v3611_v15 = vpop.f32.mrb[8].mxu1 }
 0x265   : > { %v781_v0 = vmax.f32 %v3611_v15, 0.0  ;;  %v3614_v1 = vpop.f32.mrb[9].mxu1 }
 0x266   : > { %v780_v18 = vmax.f32 %v3614_v1, 0.0  ;;  %3067 = vmatprep.subr.bf16.mxu0 %v3066_v12 }
 0x267   : > { %3069 = vmatpush3.bf16.msra.mxu0 %v3066_v12 }
 0x268   : > { %v3070_v21 = vpack.c.bf16 %v781_v0, %v780_v18  ;;  %v3621_v24 = vpop.f32.mrb[10].mxu1 }
 0x269   : > { %v783_v2 = vmax.f32 %v3621_v24, 0.0  ;;  %v3624_v4 = vpop.f32.mrb[11].mxu1 }
 0x26a   : > { %v782_v40 = vmax.f32 %v3624_v4, 0.0  ;;  %3071 = vmatprep.subr.bf16.mxu0 %v3070_v21 }
 0x26b   : > { %3073 = vmatpush3.bf16.msra.mxu0 %v3070_v21 }
 0x26c   : > { %v3074_v41 = vpack.c.bf16 %v783_v2, %v782_v40  ;;  %v3631_v42 = vpop.f32.mrb[12].mxu1 }
 0x26d   : > { %v785_v6 = vmax.f32 %v3631_v42, 0.0  ;;  %v3634_v7 = vpop.f32.mrb[13].mxu1 }
 0x26e   : > { %v784_v43 = vmax.f32 %v3634_v7, 0.0  ;;  %3075 = vmatprep.subr.bf16.mxu0 %v3074_v41 }
 0x26f   : > { %3077 = vmatpush3.bf16.msra.mxu0 %v3074_v41 }
 0x270   : > { %v3078_v44 = vpack.c.bf16 %v785_v6, %v784_v43  ;;  %v3641_v45 = vpop.f32.mrb[14].mxu1 }
 0x271   : > { %v787_v10 = vmax.f32 %v3641_v45, 0.0  ;;  %v3644_v11 = vpop.f32.mrb[15].mxu1 }
 0x272   : > { %v786_v46 = vmax.f32 %v3644_v11, 0.0  ;;  %3079 = vmatprep.subr.bf16.mxu0 %v3078_v44 }
 0x273   : > { %3081 = vmatpush3.bf16.msra.mxu0 %v3078_v44 }
 0x274   : > { %v3082_v47 = vpack.c.bf16 %v787_v10, %v786_v46 }
 0x276   : > { %3083 = vmatprep.subr.bf16.mxu0 %v3082_v47 }
 0x277   : > { %3085 = vmatpush3.bf16.msra.mxu0 %v3082_v47 }
 0x27a   : > { %2767 = vmatmul.mubr.f32.vlgmr.msra.gmra.mrb[16].mxu0 %v3431_v25 }
 0x27b   : > { %2769 = vmatprep.mubr.f32.mxu0 %v3434_v26 }
 0x27e   : > { %2770 = vmatmul.mubr.f32.gmra.mrb[18].mxu0 %v3439_v27 }
 0x27f   : > { %2772 = vmatprep.mubr.f32.mxu0 %v3442_v28 }
 0x282   : > { %2773 = vmatmul.mubr.f32.gmra.mrb[20].mxu0 %v3447_v29 }
 0x283   : > { %2775 = vmatprep.mubr.f32.mxu0 %v3450_v30 }
 0x286   : > { %2776 = vmatmul.mubr.f32.gmra.mrb[22].mxu0 %v3455_v31 }
 0x287   : > { %2778 = vmatprep.mubr.f32.mxu0 %v3458_v32 }
 0x28a   : > { %2779 = vmatmul.mubr.f32.gmra.mrb[24].mxu0 %v3463_v33 }
 0x28b   : > { %2781 = vmatprep.mubr.f32.mxu0 %v3466_v34 }
 0x28e   : > { %2782 = vmatmul.mubr.f32.gmra.mrb[26].mxu0 %v3471_v35 }
 0x28f   : > { %2784 = vmatprep.mubr.f32.mxu0 %v3474_v36 }
 0x292   : > { %2785 = vmatmul.mubr.f32.gmra.mrb[28].mxu0 %v3479_v37 }
 0x293   : > { %2787 = vmatprep.mubr.f32.mxu0 %v3482_v38 }
 0x296   : > { %2788 = vmatmul.mubr.f32.gmra.mrb[30].mxu0 %v3487_v39 }
 0x297   : > { %2862 = vmatprep.mubr.f32.mxu0 %v3387_v9  ;;  %v792_v9 = vld [vmem:[%s4140_s3 + $0x20] sm:$0xff] }
 0x298   : > { %v3094_v17 = vpack.c.bf16 %v793_v16, %v792_v9 }
 0x29a   : > { %3095 = vmatprep.subr.bf16.mxu1 %v3094_v17 }
 0x29b   : > { %3097 = vmatpush3.bf16.msra.mxu1 %v3094_v17 }
 0x29c   : > { %3099 = vmatprep.subr.bf16.mxu1 %v3098_v62 }
 0x29f   : > { %3101 = vmatpush3.bf16.msra.mxu1 %v3098_v62 }
 0x34d   : > { %v2768_v12 = vpop.f32.mrb[16].mxu0 }
 0x34e   : > { %959 = vrot.lane.b32.xlu1 %v2768_v12, %s3289_s29  ;;  %v862_v21 = vpop.f32.mrb[17].mxu0 }
 0x34f   : > { %957 = vrot.lane.b32.xlu0 %v862_v21, %s3289_s29 }
 0x351   : > { %v2771_v41 = vpop.f32.mrb[18].mxu0 }
 0x352   : > { %963 = vrot.lane.b32.xlu1 %v2771_v41, %s3289_s29  ;;  %v872_v44 = vpop.f32.mrb[19].mxu0 }
 0x353   : > { %961 = vrot.lane.b32.xlu0 %v872_v44, %s3289_s29 }
 0x355   : > { %v2774_v47 = vpop.f32.mrb[20].mxu0 }
 0x356   : > { %967 = vrot.lane.b32.xlu1 %v2774_v47, %s3289_s29  ;;  %v882_v48 = vpop.f32.mrb[21].mxu0 }
 0x357   : > { %965 = vrot.lane.b32.xlu0 %v882_v48, %s3289_s29 }
 0x359   : > { %v2777_v13 = vpop.f32.mrb[22].mxu0 }
 0x35a   : > { %971 = vrot.lane.b32.xlu1 %v2777_v13, %s3289_s29  ;;  %v892_v14 = vpop.f32.mrb[23].mxu0 }
 0x35b   : > { %969 = vrot.lane.b32.xlu0 %v892_v14, %s3289_s29 }
 0x35d   : > { %v2780_v49 = vpop.f32.mrb[24].mxu0 }
 0x35e   : > { %975 = vrot.lane.b32.xlu1 %v2780_v49, %s3289_s29  ;;  %v902_v50 = vpop.f32.mrb[25].mxu0 }
 0x35f   : > { %973 = vrot.lane.b32.xlu0 %v902_v50, %s3289_s29 }
 0x361   : > { %v2783_v51 = vpop.f32.mrb[26].mxu0 }
 0x362   : > { %979 = vrot.lane.b32.xlu1 %v2783_v51, %s3289_s29  ;;  %v912_v9 = vpop.f32.mrb[27].mxu0 }
 0x363   : > { %977 = vrot.lane.b32.xlu0 %v912_v9, %s3289_s29 }
 0x365   : > { %v2786_v16 = vpop.f32.mrb[28].mxu0 }
 0x366   : > { %983 = vrot.lane.b32.xlu1 %v2786_v16, %s3289_s29  ;;  %v922_v17 = vpop.f32.mrb[29].mxu0 }
 0x367   : > { %981 = vrot.lane.b32.xlu0 %v922_v17, %s3289_s29 }
 0x369   : > { %v2789_v54 = vpop.f32.mrb[30].mxu0 }
 0x36a   : > { %987 = vrot.lane.b32.xlu1 %v2789_v54, %s3289_s29  ;;  %v932_v57 = vpop.f32.mrb[31].mxu0 }
 0x36b   : > { %985 = vrot.lane.b32.xlu0 %v932_v57, %s3289_s29 }
 0x3c0   : > { %v960_v62 = vpop.permute.xlu1 %959 }
 0x3c1   : > { %v958_v12 = vpop.permute.xlu0 %957  ;;  %v1007_v41 = vsel %vm1005_vm1, %v773_v19, %v960_v62 }
 0x3c2   : > { %v1006_v21 = vsel %vm1005_vm1, %v772_v20, %v958_v12 }
 0x3c3   : > { %2806 = vmatprep.mubr.msk.f32.mxu1 %vm610_vm0, %v1006_v21 }
 0x3c4   : > { %2807 = vmatmul.mubr.msk.f32.vlgmr.msra.gmra.mrb[16].mxu1 %vm610_vm0, %v1007_v41  ;;  %v964_v44 = vpop.permute.xlu1 %963 }
 0x3c5   : > { %v962_v47 = vpop.permute.xlu0 %961  ;;  %v1009_v53 = vsel %vm1005_vm1, %v775_v22, %v964_v44 }
 0x3c6   : > { %v1008_v48 = vsel %vm1005_vm1, %v774_v56, %v962_v47 }
 0x3c7   : > { %2809 = vmatprep.mubr.msk.f32.mxu1 %vm610_vm0, %v1008_v48 }
 0x3c8   : > { %2810 = vmatmul.mubr.msk.f32.gmra.mrb[18].mxu1 %vm610_vm0, %v1009_v53  ;;  %v968_v52 = vpop.permute.xlu1 %967 }
 0x3c9   : > { %v966_v19 = vpop.permute.xlu0 %965  ;;  %v1011_v23 = vsel %vm1005_vm1, %v777_v59, %v968_v52 }
 0x3ca   : > { %v1010_v20 = vsel %vm1005_vm1, %v776_v61, %v966_v19 }
 0x3cb   : > { %2812 = vmatprep.mubr.msk.f32.mxu1 %vm610_vm0, %v1010_v20 }
 0x3cc   : > { %2813 = vmatmul.mubr.msk.f32.gmra.mrb[20].mxu1 %vm610_vm0, %v1011_v23  ;;  %v972_v55 = vpop.permute.xlu1 %971 }
 0x3cd   : > { %v970_v22 = vpop.permute.xlu0 %969  ;;  %v1013_v60 = vsel %vm1005_vm1, %v779_v3, %v972_v55 }
 0x3ce   : > { %v1012_v56 = vsel %vm1005_vm1, %v778_v8, %v970_v22 }
 0x3cf   : > { %2815 = vmatprep.mubr.msk.f32.mxu1 %vm610_vm0, %v1012_v56 }
 0x3d0   : > { %2816 = vmatmul.mubr.msk.f32.gmra.mrb[22].mxu1 %vm610_vm0, %v1013_v60  ;;  %v976_v58 = vpop.permute.xlu1 %975 }
 0x3d1   : > { %v974_v59 = vpop.permute.xlu0 %973  ;;  %v1015_v5 = vsel %vm1005_vm1, %v781_v0, %v976_v58 }
 0x3d2   : > { %v1014_v61 = vsel %vm1005_vm1, %v780_v18, %v974_v59 }
 0x3d3   : > { %2818 = vmatprep.mubr.msk.f32.mxu1 %vm610_vm0, %v1014_v61 }
 0x3d4   : > { %2819 = vmatmul.mubr.msk.f32.gmra.mrb[24].mxu1 %vm610_vm0, %v1015_v5  ;;  %v980_v63 = vpop.permute.xlu1 %979 }
 0x3d5   : > { %v978_v3 = vpop.permute.xlu0 %977  ;;  %v1017_v1 = vsel %vm1005_vm1, %v783_v2, %v980_v63 }
 0x3d6   : > { %v1016_v8 = vsel %vm1005_vm1, %v782_v40, %v978_v3 }
 0x3d7   : > { %2821 = vmatprep.mubr.msk.f32.mxu1 %vm610_vm0, %v1016_v8 }
 0x3d8   : > { %2822 = vmatmul.mubr.msk.f32.gmra.mrb[26].mxu1 %vm610_vm0, %v1017_v1  ;;  %v984_v15 = vpop.permute.xlu1 %983 }
 0x3d9   : > { %v982_v0 = vpop.permute.xlu0 %981  ;;  %v1019_v4 = vsel %vm1005_vm1, %v785_v6, %v984_v15 }
 0x3da   : > { %v1018_v18 = vsel %vm1005_vm1, %v784_v43, %v982_v0 }
 0x3db   : > { %2824 = vmatprep.mubr.msk.f32.mxu1 %vm610_vm0, %v1018_v18 }
 0x3dc   : > { %2825 = vmatmul.mubr.msk.f32.gmra.mrb[28].mxu1 %vm610_vm0, %v1019_v4  ;;  %v988_v24 = vpop.permute.xlu1 %987 }
 0x3dd   : > { %v986_v2 = vpop.permute.xlu0 %985  ;;  %v1021_v7 = vsel %vm1005_vm1, %v787_v10, %v988_v24 }
 0x3de   : > { %v1020_v40 = vsel %vm1005_vm1, %v786_v46, %v986_v2 }
 0x3df   : > { %2827 = vmatprep.mubr.msk.f32.mxu1 %vm610_vm0, %v1020_v40  ;;  %v1657_v40 = vld [vmem:[%s4142_s5] sm:$0xff] }
 0x3e0   : > { %2828 = vmatmul.mubr.msk.f32.gmra.mrb[30].mxu1 %vm610_vm0, %v1021_v7  ;;  %v1658_v7 = vld [vmem:[%s4142_s5 + $0x8] sm:$0xff] }
 0x497   : > { %v3771_v42 = vpop.f32.mrb[16].mxu1 }
 0x498   : > { %v1216_v6 = vmax.f32 %v3771_v42, 0.0  ;;  %v3774_v43 = vpop.f32.mrb[17].mxu1 }
 0x499   : > { %v1215_v13 = vmax.f32 %v3774_v43, 0.0 }
 0x49b   : > { %v3102_v11 = vpack.c.bf16 %v1216_v6, %v1215_v13  ;;  %v3781_v45 = vpop.f32.mrb[18].mxu1 }
 0x49c   : > { %v1218_v10 = vmax.f32 %v3781_v45, 0.0  ;;  %v3784_v46 = vpop.f32.mrb[19].mxu1 }
 0x49d   : > { %v1217_v14 = vmax.f32 %v3784_v46, 0.0  ;;  %3103 = vmatprep.subr.bf16.mxu0 %v3102_v11 }
 0x49e   : > { %3105 = vmatpush3.bf16.msra.mxu0 %v3102_v11  ;;  %v1659_v11 = vld [vmem:[%s4142_s5 + $0x10] sm:$0xff] }
 0x49f   : > { %v3106_v49 = vpack.c.bf16 %v1218_v10, %v1217_v14  ;;  %v3791_v50 = vpop.f32.mrb[20].mxu1 }
 0x4a0   : > { %v1220_v51 = vmax.f32 %v3791_v50, 0.0  ;;  %v3794_v9 = vpop.f32.mrb[21].mxu1 }
 0x4a1   : > { %v1219_v16 = vmax.f32 %v3794_v9, 0.0  ;;  %3107 = vmatprep.subr.bf16.mxu0 %v3106_v49 }
 0x4a2   : > { %3109 = vmatpush3.bf16.msra.mxu0 %v3106_v49 }
 0x4a3   : > { %v3110_v17 = vpack.c.bf16 %v1220_v51, %v1219_v16  ;;  %v3801_v54 = vpop.f32.mrb[22].mxu1 }
 0x4a4   : > { %v1222_v57 = vmax.f32 %v3801_v54, 0.0  ;;  %v3804_v62 = vpop.f32.mrb[23].mxu1 }
 0x4a5   : > { %v1221_v12 = vmax.f32 %v3804_v62, 0.0  ;;  %3111 = vmatprep.subr.bf16.mxu0 %v3110_v17 }
 0x4a6   : > { %3113 = vmatpush3.bf16.msra.mxu0 %v3110_v17  ;;  %v3150_v17 = vpack.c.bf16 %v1658_v7, %v1657_v40 }
 0x4a7   : > { %v3114_v21 = vpack.c.bf16 %v1222_v57, %v1221_v12  ;;  %v3811_v41 = vpop.f32.mrb[24].mxu1 }
 0x4a8   : > { %v1224_v44 = vmax.f32 %v3811_v41, 0.0  ;;  %v3814_v47 = vpop.f32.mrb[25].mxu1 }
 0x4a9   : > { %v1223_v48 = vmax.f32 %v3814_v47, 0.0  ;;  %3115 = vmatprep.subr.bf16.mxu0 %v3114_v21 }
 0x4aa   : > { %3117 = vmatpush3.bf16.msra.mxu0 %v3114_v21  ;;  %v1660_v21 = vld [vmem:[%s4142_s5 + $0x18] sm:$0xff] }
 0x4ab   : > { %v3118_v53 = vpack.c.bf16 %v1224_v44, %v1223_v48  ;;  %v3821_v52 = vpop.f32.mrb[26].mxu1 }
 0x4ac   : > { %v1226_v19 = vmax.f32 %v3821_v52, 0.0  ;;  %v3824_v20 = vpop.f32.mrb[27].mxu1 }
 0x4ad   : > { %v1225_v23 = vmax.f32 %v3824_v20, 0.0  ;;  %3119 = vmatprep.subr.bf16.mxu0 %v3118_v53 }
 0x4ae   : > { %3121 = vmatpush3.bf16.msra.mxu0 %v3118_v53 }
 0x4af   : > { %v3122_v55 = vpack.c.bf16 %v1226_v19, %v1225_v23  ;;  %v3831_v22 = vpop.f32.mrb[28].mxu1 }
 0x4b0   : > { %v1228_v56 = vmax.f32 %v3831_v22, 0.0  ;;  %v3834_v60 = vpop.f32.mrb[29].mxu1  ;;  %v1877_v22 = vld [vmem:[%s4144_s7] sm:$0xff] }
 0x4b1   : > { %v1227_v58 = vmax.f32 %v3834_v60, 0.0  ;;  %3123 = vmatprep.subr.bf16.mxu0 %v3122_v55 }
 0x4b2   : > { %3125 = vmatpush3.bf16.msra.mxu0 %v3122_v55  ;;  %v3154_v55 = vpack.c.bf16 %v1660_v21, %v1659_v11  ;;  %v2367_v11 = vld [vmem:[%s4143_s6] ss:$0 sm:$0xff] }
 0x4b3   : > { %v3126_v59 = vpack.c.bf16 %v1228_v56, %v1227_v58  ;;  %v3841_v61 = vpop.f32.mrb[30].mxu1 }
 0x4b4   : > { %v1230_v5 = vmax.f32 %v3841_v61, 0.0  ;;  %v3844_v63 = vpop.f32.mrb[31].mxu1  ;;  %v1880_v61 = vld [vmem:[%s4144_s7 + $0x18] sm:$0xff] }
 0x4b5   : > { %v1229_v3 = vmax.f32 %v3844_v63, 0.0  ;;  %3127 = vmatprep.subr.bf16.mxu0 %v3126_v59 }
 0x4b6   : > { %3129 = vmatpush3.bf16.msra.mxu0 %v3126_v59 }
 0x4b7   : > { %v3130_v8 = vpack.c.bf16 %v1230_v5, %v1229_v3 }
 0x4b9   : > { %3131 = vmatprep.subr.bf16.mxu0 %v3130_v8 }
 0x4ba   : > { %3133 = vmatpush3.bf16.msra.mxu0 %v3130_v8 }
 0x4bb   : > { %3151 = vmatprep.subr.bf16.mxu0 %v3150_v17 }
 0x4bd   : > { %2863 = vmatmul.mubr.f32.vlgmr.msra.gmra.mrb[32].mxu0 %v3431_v25  ;;  %v1231_v25 = vld [vmem:[%s4141_s4] sm:$0xff] }
 0x4be   : > { %2865 = vmatprep.mubr.f32.mxu0 %v3434_v26  ;;  %v1232_v26 = vld [vmem:[%s4141_s4 + $0x8] sm:$0xff]  ;;  %3153 = vmatpush3.bf16.msra.mxu0 %v3150_v17 }
 0x4bf   : > { %3155 = vmatprep.subr.bf16.mxu0 %v3154_v55 }
 0x4c1   : > { %2866 = vmatmul.mubr.f32.gmra.mrb[34].mxu0 %v3439_v27  ;;  %v1233_v27 = vld [vmem:[%s4141_s4 + $0x10] sm:$0xff] }
 0x4c2   : > { %2868 = vmatprep.mubr.f32.mxu0 %v3442_v28  ;;  %v3134_v28 = vpack.c.bf16 %v1232_v26, %v1231_v25  ;;  %3157 = vmatpush3.bf16.msra.mxu0 %v3154_v55 }
 0x4c4   : > { %3135 = vmatprep.subr.bf16.mxu1 %v3134_v28 }
 0x4c5   : > { %2869 = vmatmul.mubr.f32.gmra.mrb[36].mxu0 %v3447_v29  ;;  %v1234_v29 = vld [vmem:[%s4141_s4 + $0x18] sm:$0xff]  ;;  %3137 = vmatpush3.bf16.msra.mxu1 %v3134_v28 }
 0x4c6   : > { %2871 = vmatprep.mubr.f32.mxu0 %v3450_v30  ;;  %v3138_v30 = vpack.c.bf16 %v1234_v29, %v1233_v27 }
 0x4c8   : > { %3139 = vmatprep.subr.bf16.mxu1 %v3138_v30 }
 0x4c9   : > { %2872 = vmatmul.mubr.f32.gmra.mrb[38].mxu0 %v3455_v31  ;;  %v1235_v31 = vld [vmem:[%s4141_s4 + $0x20] sm:$0xff]  ;;  %3141 = vmatpush3.bf16.msra.mxu1 %v3138_v30 }
 0x4ca   : > { %2874 = vmatprep.mubr.f32.mxu0 %v3458_v32  ;;  %v1236_v32 = vld [vmem:[%s4141_s4 + $0x28] sm:$0xff] }
 0x4cd   : > { %2875 = vmatmul.mubr.f32.gmra.mrb[40].mxu0 %v3463_v33  ;;  %v3142_v33 = vpack.c.bf16 %v1236_v32, %v1235_v31 }
 0x4ce   : > { %2877 = vmatprep.mubr.f32.mxu0 %v3466_v34  ;;  %v1237_v34 = vld [vmem:[%s4141_s4 + $0x30] sm:$0xff] }
 0x4cf   : > { %3143 = vmatprep.subr.bf16.mxu1 %v3142_v33 }
 0x4d0   : > { %3145 = vmatpush3.bf16.msra.mxu1 %v3142_v33 }
 0x4d1   : > { %2878 = vmatmul.mubr.f32.gmra.mrb[42].mxu0 %v3471_v35  ;;  %v1238_v35 = vld [vmem:[%s4141_s4 + $0x38] sm:$0xff] }
 0x4d2   : > { %2880 = vmatprep.mubr.f32.mxu0 %v3474_v36  ;;  %v3146_v36 = vpack.c.bf16 %v1238_v35, %v1237_v34 }
 0x4d4   : > { %3147 = vmatprep.subr.bf16.mxu1 %v3146_v36 }
 0x4d5   : > { %2881 = vmatmul.mubr.f32.gmra.mrb[44].mxu0 %v3479_v37  ;;  %3149 = vmatpush3.bf16.msra.mxu1 %v3146_v36 }
 0x4d6   : > { %2883 = vmatprep.mubr.f32.mxu0 %v3482_v38 }
 0x4d9   : > { %2884 = vmatmul.mubr.f32.gmra.mrb[46].mxu0 %v3487_v39 }
 0x590   : > { %v2864_v37 = vpop.f32.mrb[32].mxu0 }
 0x591   : > { %1402 = vrot.lane.b32.xlu1 %v2864_v37, %s3289_s29  ;;  %v1305_v38 = vpop.f32.mrb[33].mxu0 }
 0x592   : > { %1400 = vrot.lane.b32.xlu0 %v1305_v38, %s3289_s29 }
 0x594   : > { %v2867_v39 = vpop.f32.mrb[34].mxu0 }
 0x595   : > { %1406 = vrot.lane.b32.xlu1 %v2867_v39, %s3289_s29  ;;  %v1315_v1 = vpop.f32.mrb[35].mxu0 }
 0x596   : > { %1404 = vrot.lane.b32.xlu0 %v1315_v1, %s3289_s29 }
 0x598   : > { %v2870_v15 = vpop.f32.mrb[36].mxu0 }
 0x599   : > { %1410 = vrot.lane.b32.xlu1 %v2870_v15, %s3289_s29  ;;  %v1325_v0 = vpop.f32.mrb[37].mxu0 }
 0x59a   : > { %1408 = vrot.lane.b32.xlu0 %v1325_v0, %s3289_s29 }
 0x59c   : > { %v2873_v18 = vpop.f32.mrb[38].mxu0 }
 0x59d   : > { %1414 = vrot.lane.b32.xlu1 %v2873_v18, %s3289_s29  ;;  %v1335_v4 = vpop.f32.mrb[39].mxu0 }
 0x59e   : > { %1412 = vrot.lane.b32.xlu0 %v1335_v4, %s3289_s29 }
 0x5a0   : > { %v2876_v24 = vpop.f32.mrb[40].mxu0 }
 0x5a1   : > { %1418 = vrot.lane.b32.xlu1 %v2876_v24, %s3289_s29  ;;  %v1345_v2 = vpop.f32.mrb[41].mxu0 }
 0x5a2   : > { %1416 = vrot.lane.b32.xlu0 %v1345_v2, %s3289_s29 }
 0x5a4   : > { %v2879_v49 = vpop.f32.mrb[42].mxu0 }
 0x5a5   : > { %1422 = vrot.lane.b32.xlu1 %v2879_v49, %s3289_s29  ;;  %v1355_v53 = vpop.f32.mrb[43].mxu0 }
 0x5a6   : > { %1420 = vrot.lane.b32.xlu0 %v1355_v53, %s3289_s29 }
 0x5a8   : > { %v2882_v59 = vpop.f32.mrb[44].mxu0 }
 0x5a9   : > { %1426 = vrot.lane.b32.xlu1 %v2882_v59, %s3289_s29  ;;  %v1365_v8 = vpop.f32.mrb[45].mxu0 }
 0x5aa   : > { %1424 = vrot.lane.b32.xlu0 %v1365_v8, %s3289_s29 }
 0x5ac   : > { %v2885_v25 = vpop.f32.mrb[46].mxu0 }
 0x5ad   : > { %1430 = vrot.lane.b32.xlu1 %v2885_v25, %s3289_s29  ;;  %v1375_v26 = vpop.f32.mrb[47].mxu0 }
 0x5ae   : > { %1428 = vrot.lane.b32.xlu0 %v1375_v26, %s3289_s29 }
 0x603   : > { %v1403_v27 = vpop.permute.xlu1 %1402 }
 0x604   : > { %v1401_v28 = vpop.permute.xlu0 %1400  ;;  %v1449_v30 = vsel %vm1005_vm1, %v1216_v6, %v1403_v27 }
 0x605   : > { %v1448_v29 = vsel %vm1005_vm1, %v1215_v13, %v1401_v28 }
 0x606   : > { %2902 = vmatprep.mubr.msk.f32.mxu1 %vm610_vm0, %v1448_v29 }
 0x607   : > { %2903 = vmatmul.mubr.msk.f32.vlgmr.msra.gmra.mrb[32].mxu1 %vm610_vm0, %v1449_v30  ;;  %v1407_v31 = vpop.permute.xlu1 %1406 }
 0x608   : > { %v1405_v32 = vpop.permute.xlu0 %1404  ;;  %v1451_v43 = vsel %vm1005_vm1, %v1218_v10, %v1407_v31 }
 0x609   : > { %v1450_v33 = vsel %vm1005_vm1, %v1217_v14, %v1405_v32 }
 0x60a   : > { %2905 = vmatprep.mubr.msk.f32.mxu1 %vm610_vm0, %v1450_v33 }
 0x60b   : > { %2906 = vmatmul.mubr.msk.f32.gmra.mrb[34].mxu1 %vm610_vm0, %v1451_v43  ;;  %v1411_v42 = vpop.permute.xlu1 %1410 }
 0x60c   : > { %v1409_v6 = vpop.permute.xlu0 %1408  ;;  %v1453_v46 = vsel %vm1005_vm1, %v1220_v51, %v1411_v42 }
 0x60d   : > { %v1452_v13 = vsel %vm1005_vm1, %v1219_v16, %v1409_v6 }
 0x60e   : > { %2908 = vmatprep.mubr.msk.f32.mxu1 %vm610_vm0, %v1452_v13 }
 0x60f   : > { %2909 = vmatmul.mubr.msk.f32.gmra.mrb[36].mxu1 %vm610_vm0, %v1453_v46  ;;  %v1415_v45 = vpop.permute.xlu1 %1414 }
 0x610   : > { %v1413_v10 = vpop.permute.xlu0 %1412  ;;  %v1455_v9 = vsel %vm1005_vm1, %v1222_v57, %v1415_v45 }
 0x611   : > { %v1454_v14 = vsel %vm1005_vm1, %v1221_v12, %v1413_v10 }
 0x612   : > { %2911 = vmatprep.mubr.msk.f32.mxu1 %vm610_vm0, %v1454_v14 }
 0x613   : > { %2912 = vmatmul.mubr.msk.f32.gmra.mrb[38].mxu1 %vm610_vm0, %v1455_v9  ;;  %v1419_v50 = vpop.permute.xlu1 %1418 }
 0x614   : > { %v1417_v51 = vpop.permute.xlu0 %1416  ;;  %v1457_v62 = vsel %vm1005_vm1, %v1224_v44, %v1419_v50 }
 0x615   : > { %v1456_v16 = vsel %vm1005_vm1, %v1223_v48, %v1417_v51 }
 0x616   : > { %2914 = vmatprep.mubr.msk.f32.mxu1 %vm610_vm0, %v1456_v16 }
 0x617   : > { %2915 = vmatmul.mubr.msk.f32.gmra.mrb[40].mxu1 %vm610_vm0, %v1457_v62  ;;  %v1423_v54 = vpop.permute.xlu1 %1422 }
 0x618   : > { %v1421_v57 = vpop.permute.xlu0 %1420  ;;  %v1459_v47 = vsel %vm1005_vm1, %v1226_v19, %v1423_v54 }
 0x619   : > { %v1458_v12 = vsel %vm1005_vm1, %v1225_v23, %v1421_v57 }
 0x61a   : > { %2917 = vmatprep.mubr.msk.f32.mxu1 %vm610_vm0, %v1458_v12 }
 0x61b   : > { %2918 = vmatmul.mubr.msk.f32.gmra.mrb[42].mxu1 %vm610_vm0, %v1459_v47  ;;  %v1427_v41 = vpop.permute.xlu1 %1426 }
 0x61c   : > { %v1425_v44 = vpop.permute.xlu0 %1424  ;;  %v1461_v20 = vsel %vm1005_vm1, %v1228_v56, %v1427_v41  ;;  %v1878_v56 = vld [vmem:[%s4144_s7 + $0x8] sm:$0xff] }
 0x61d   : > { %v1460_v48 = vsel %vm1005_vm1, %v1227_v58, %v1425_v44  ;;  %v1879_v58 = vld [vmem:[%s4144_s7 + $0x10] sm:$0xff]  ;;  %v3158_v63 = vpack.c.bf16 %v1878_v56, %v1877_v22 }
 0x61e   : > { %2920 = vmatprep.mubr.msk.f32.mxu1 %vm610_vm0, %v1460_v48 }
 0x61f   : > { %2921 = vmatmul.mubr.msk.f32.gmra.mrb[44].mxu1 %vm610_vm0, %v1461_v20  ;;  %v1431_v52 = vpop.permute.xlu1 %1430  ;;  %3159 = vmatprep.subr.bf16.mxu1 %v3158_v63 }
 0x620   : > { %v1429_v19 = vpop.permute.xlu0 %1428  ;;  %v1463_v60 = vsel %vm1005_vm1, %v1230_v5, %v1431_v52  ;;  %v3162_v5 = vpack.c.bf16 %v1880_v61, %v1879_v58  ;;  %3161 = vmatpush3.bf16.msra.mxu1 %v3158_v63 }
 0x621   : > { %v1462_v23 = vsel %vm1005_vm1, %v1229_v3, %v1429_v19 }
 0x622   : > { %2923 = vmatprep.mubr.msk.f32.mxu1 %vm610_vm0, %v1462_v23  ;;  %3163 = vmatprep.subr.bf16.mxu1 %v3162_v5 }
 0x623   : > { %2924 = vmatmul.mubr.msk.f32.gmra.mrb[46].mxu1 %vm610_vm0, %v1463_v60 }
 0x624   : > { %3165 = vmatpush3.bf16.msra.mxu1 %v3162_v5 }
 0x6da   : > { %v2904_v3 = vpop.f32.mrb[32].mxu1 }
 0x6db   : > { %v1578_v34 = vpop.f32.mrb[33].mxu1 }
 0x6dc   : > { %2934 = vmatprep.mubr.msk.f32.mxu0 %vm1005_vm1, %v1578_v34  ;;  %v2384_v34 = vld [vmem:[%s4145_s8] ss:$0 sm:$0xff] }
 0x6dd   : > { %2935 = vmatmul.mubr.msk.f32.vlgmr.msra.gmra.mrb[48].mxu0 %vm1005_vm1, %v2904_v3 }
 0x6de   : > { %v2907_v35 = vpop.f32.mrb[34].mxu1 }
 0x6df   : > { %v1588_v36 = vpop.f32.mrb[35].mxu1 }
 0x6e0   : > { %2937 = vmatprep.mubr.msk.f32.mxu0 %vm1005_vm1, %v1588_v36 }
 0x6e1   : > { %2938 = vmatmul.mubr.msk.f32.gmra.mrb[50].mxu0 %vm1005_vm1, %v2907_v35 }
 0x6e2   : > { %v2910_v37 = vpop.f32.mrb[36].mxu1 }
 0x6e3   : > { %v1598_v38 = vpop.f32.mrb[37].mxu1 }
 0x6e4   : > { %2940 = vmatprep.mubr.msk.f32.mxu0 %vm1005_vm1, %v1598_v38 }
 0x6e5   : > { %2941 = vmatmul.mubr.msk.f32.gmra.mrb[52].mxu0 %vm1005_vm1, %v2910_v37 }
 0x6e6   : > { %v2913_v39 = vpop.f32.mrb[38].mxu1 }
 0x6e7   : > { %v1608_v1 = vpop.f32.mrb[39].mxu1 }
 0x6e8   : > { %2943 = vmatprep.mubr.msk.f32.mxu0 %vm1005_vm1, %v1608_v1 }
 0x6e9   : > { %2944 = vmatmul.mubr.msk.f32.gmra.mrb[54].mxu0 %vm1005_vm1, %v2913_v39 }
 0x6ea   : > { %v2916_v15 = vpop.f32.mrb[40].mxu1 }
 0x6eb   : > { %v1618_v0 = vpop.f32.mrb[41].mxu1 }
 0x6ec   : > { %2946 = vmatprep.mubr.msk.f32.mxu0 %vm1005_vm1, %v1618_v0 }
 0x6ed   : > { %2947 = vmatmul.mubr.msk.f32.gmra.mrb[56].mxu0 %vm1005_vm1, %v2916_v15 }
 0x6ee   : > { %v2919_v18 = vpop.f32.mrb[42].mxu1 }
 0x6ef   : > { %v1628_v4 = vpop.f32.mrb[43].mxu1 }
 0x6f0   : > { %2949 = vmatprep.mubr.msk.f32.mxu0 %vm1005_vm1, %v1628_v4 }
 0x6f1   : > { %2950 = vmatmul.mubr.msk.f32.gmra.mrb[58].mxu0 %vm1005_vm1, %v2919_v18 }
 0x6f2   : > { %v2922_v24 = vpop.f32.mrb[44].mxu1 }
 0x6f3   : > { %v1638_v2 = vpop.f32.mrb[45].mxu1 }
 0x6f4   : > { %2952 = vmatprep.mubr.msk.f32.mxu0 %vm1005_vm1, %v1638_v2 }
 0x6f5   : > { %2953 = vmatmul.mubr.msk.f32.gmra.mrb[60].mxu0 %vm1005_vm1, %v2922_v24 }
 0x6f6   : > { %v2925_v40 = vpop.f32.mrb[46].mxu1 }
 0x6f7   : > { %v1648_v7 = vpop.f32.mrb[47].mxu1 }
 0x6f8   : > { %2955 = vmatprep.mubr.msk.f32.mxu0 %vm1005_vm1, %v1648_v7 }
 0x6f9   : > { %2956 = vmatmul.mubr.msk.f32.gmra.mrb[62].mxu0 %vm1005_vm1, %v2925_v40 }
 0x7b0   : > { %v2936_v49 = vpop.f32.mrb[48].mxu0 }
 0x7b1   : > { %v1788_v17 = vadd.f32 %v2936_v49, %v2367_v11  ;;  %v1782_v21 = vpop.f32.mrb[49].mxu0 }
 0x7b2   : > { %v1783_v53 = vadd.f32 %v2367_v11, %v1782_v21 }
 0x7b3   : > { %v1862_v8 = vmax.f32 %v1788_v17, 0.0 }
 0x7b4   : > { %v1861_v55 = vmax.f32 %v1783_v53, 0.0  ;;  %v2939_v59 = vpop.f32.mrb[50].mxu0 }
 0x7b5   : > { %v1798_v25 = vadd.f32 %v2939_v59, %v2367_v11  ;;  %v1792_v26 = vpop.f32.mrb[51].mxu0 }
 0x7b6   : > { %v1793_v27 = vadd.f32 %v2367_v11, %v1792_v26  ;;  %2966 = vmatprep.mubr.msk.f32.mxu1 %vm1005_vm1, %v1861_v55 }
 0x7b7   : > { %2967 = vmatmul.mubr.msk.f32.vlgmr.msra.gmra.mrb[48].mxu1 %vm1005_vm1, %v1862_v8  ;;  %v1864_v30 = vmax.f32 %v1798_v25, 0.0 }
 0x7b8   : > { %v1863_v28 = vmax.f32 %v1793_v27, 0.0  ;;  %v2942_v29 = vpop.f32.mrb[52].mxu0 }
 0x7b9   : > { %v1808_v31 = vadd.f32 %v2942_v29, %v2367_v11  ;;  %v1802_v32 = vpop.f32.mrb[53].mxu0 }
 0x7ba   : > { %v1803_v33 = vadd.f32 %v2367_v11, %v1802_v32  ;;  %2969 = vmatprep.mubr.msk.f32.mxu1 %vm1005_vm1, %v1863_v28 }
 0x7bb   : > { %2970 = vmatmul.mubr.msk.f32.gmra.mrb[50].mxu1 %vm1005_vm1, %v1864_v30  ;;  %v1866_v6 = vmax.f32 %v1808_v31, 0.0 }
 0x7bc   : > { %v1865_v43 = vmax.f32 %v1803_v33, 0.0  ;;  %v2945_v42 = vpop.f32.mrb[54].mxu0 }
 0x7bd   : > { %v1818_v13 = vadd.f32 %v2945_v42, %v2367_v11  ;;  %v1812_v46 = vpop.f32.mrb[55].mxu0 }
 0x7be   : > { %v1813_v45 = vadd.f32 %v2367_v11, %v1812_v46  ;;  %2972 = vmatprep.mubr.msk.f32.mxu1 %vm1005_vm1, %v1865_v43 }
 0x7bf   : > { %2973 = vmatmul.mubr.msk.f32.gmra.mrb[52].mxu1 %vm1005_vm1, %v1866_v6  ;;  %v1868_v9 = vmax.f32 %v1818_v13, 0.0 }
 0x7c0   : > { %v1867_v10 = vmax.f32 %v1813_v45, 0.0  ;;  %v2948_v14 = vpop.f32.mrb[56].mxu0 }
 0x7c1   : > { %v1828_v50 = vadd.f32 %v2948_v14, %v2367_v11  ;;  %v1822_v51 = vpop.f32.mrb[57].mxu0 }
 0x7c2   : > { %v1823_v16 = vadd.f32 %v2367_v11, %v1822_v51  ;;  %2975 = vmatprep.mubr.msk.f32.mxu1 %vm1005_vm1, %v1867_v10 }
 0x7c3   : > { %2976 = vmatmul.mubr.msk.f32.gmra.mrb[54].mxu1 %vm1005_vm1, %v1868_v9  ;;  %v1870_v57 = vmax.f32 %v1828_v50, 0.0 }
 0x7c4   : > { %v1869_v62 = vmax.f32 %v1823_v16, 0.0  ;;  %v2951_v54 = vpop.f32.mrb[58].mxu0 }
 0x7c5   : > { %v1838_v12 = vadd.f32 %v2951_v54, %v2367_v11  ;;  %v1832_v47 = vpop.f32.mrb[59].mxu0 }
 0x7c6   : > { %v1833_v41 = vadd.f32 %v2367_v11, %v1832_v47  ;;  %2978 = vmatprep.mubr.msk.f32.mxu1 %vm1005_vm1, %v1869_v62 }
 0x7c7   : > { %2979 = vmatmul.mubr.msk.f32.gmra.mrb[56].mxu1 %vm1005_vm1, %v1870_v57  ;;  %v1872_v20 = vmax.f32 %v1838_v12, 0.0 }
 0x7c8   : > { %v1871_v44 = vmax.f32 %v1833_v41, 0.0  ;;  %v2954_v48 = vpop.f32.mrb[60].mxu0 }
 0x7c9   : > { %v1848_v52 = vadd.f32 %v2954_v48, %v2367_v11  ;;  %v1842_v19 = vpop.f32.mrb[61].mxu0 }
 0x7ca   : > { %v1843_v23 = vadd.f32 %v2367_v11, %v1842_v19  ;;  %2981 = vmatprep.mubr.msk.f32.mxu1 %vm1005_vm1, %v1871_v44 }
 0x7cb   : > { %2982 = vmatmul.mubr.msk.f32.gmra.mrb[58].mxu1 %vm1005_vm1, %v1872_v20  ;;  %v1874_v56 = vmax.f32 %v1848_v52, 0.0 }
 0x7cc   : > { %v1873_v60 = vmax.f32 %v1843_v23, 0.0  ;;  %v2957_v22 = vpop.f32.mrb[62].mxu0 }
 0x7cd   : > { %v1858_v58 = vadd.f32 %v2957_v22, %v2367_v11  ;;  %v1852_v63 = vpop.f32.mrb[63].mxu0 }
 0x7ce   : > { %v1853_v61 = vadd.f32 %v2367_v11, %v1852_v63  ;;  %2984 = vmatprep.mubr.msk.f32.mxu1 %vm1005_vm1, %v1873_v60 }
 0x7cf   : > { %2985 = vmatmul.mubr.msk.f32.gmra.mrb[60].mxu1 %vm1005_vm1, %v1874_v56  ;;  %v1876_v3 = vmax.f32 %v1858_v58, 0.0 }
 0x7d0   : > { %v1875_v5 = vmax.f32 %v1853_v61, 0.0 }
 0x7d2   : > { %2987 = vmatprep.mubr.msk.f32.mxu1 %vm1005_vm1, %v1875_v5 }
 0x7d3   : > { %2988 = vmatmul.mubr.msk.f32.gmra.mrb[62].mxu1 %vm1005_vm1, %v1876_v3 }
 0x88a   : > { %v2968_v35 = vpop.f32.mrb[48].mxu1 }
 0x88b   : > { %v2008_v36 = vadd.f32 %v2968_v35, %v2384_v34  ;;  %v2002_v37 = vpop.f32.mrb[49].mxu1 }
 0x88c   : > { %v2003_v38 = vadd.f32 %v2384_v34, %v2002_v37 }
 0x88d   : > { %2083 = vmax.xlane.f32.xlu1 %v2008_v36 }
 0x88e   : > { %v2971_v39 = vpop.f32.mrb[50].mxu1  ;;  %2081 = vmax.xlane.f32.xlu0 %v2003_v38 }
 0x88f   : > { %v2018_v1 = vadd.f32 %v2971_v39, %v2384_v34  ;;  %v2012_v15 = vpop.f32.mrb[51].mxu1 }
 0x890   : > { %v2013_v4 = vadd.f32 %v2384_v34, %v2012_v15 }
 0x892   : > { %v2974_v0 = vpop.f32.mrb[52].mxu1  ;;  %2087 = vmax.xlane.f32.xlu0 %v2018_v1 }
 0x893   : > { %v2022_v18 = vpop.f32.mrb[53].mxu1  ;;  %v2028_v7 = vadd.f32 %v2974_v0, %v2384_v34 }
 0x894   : > { %v2023_v24 = vadd.f32 %v2384_v34, %v2022_v18 }
 0x896   : > { %v2977_v2 = vpop.f32.mrb[54].mxu1  ;;  %2089 = vmax.xlane.f32.xlu1 %v2023_v24  ;;  %2085 = vmax.xlane.f32.xlu0 %v2013_v4 }
 0x897   : > { %v2032_v40 = vpop.f32.mrb[55].mxu1  ;;  %v2038_v21 = vadd.f32 %v2977_v2, %v2384_v34 }
 0x898   : > { %v2033_v11 = vadd.f32 %v2384_v34, %v2032_v40 }
 0x89a   : > { %v2980_v49 = vpop.f32.mrb[56].mxu1  ;;  %2093 = vmax.xlane.f32.xlu1 %v2033_v11  ;;  %2091 = vmax.xlane.f32.xlu0 %v2028_v7 }
 0x89b   : > { %v2042_v17 = vpop.f32.mrb[57].mxu1  ;;  %v2048_v8 = vadd.f32 %v2980_v49, %v2384_v34 }
 0x89c   : > { %v2043_v53 = vadd.f32 %v2384_v34, %v2042_v17 }
 0x89e   : > { %v2983_v55 = vpop.f32.mrb[58].mxu1  ;;  %2097 = vmax.xlane.f32.xlu1 %v2043_v53  ;;  %2095 = vmax.xlane.f32.xlu0 %v2038_v21 }
 0x89f   : > { %v2052_v59 = vpop.f32.mrb[59].mxu1  ;;  %v4032_v28 = vadd.f32 %v2983_v55, %v2384_v34 }
 0x8a0   : > { %v2053_v25 = vadd.f32 %v2384_v34, %v2052_v59 }
 0x8a2   : > { %v2986_v26 = vpop.f32.mrb[60].mxu1  ;;  %2101 = vmax.xlane.f32.xlu1 %v2053_v25  ;;  %2099 = vmax.xlane.f32.xlu0 %v2048_v8 }
 0x8a3   : > { %v2062_v27 = vpop.f32.mrb[61].mxu1  ;;  %v4035_v32 = vadd.f32 %v2986_v26, %v2384_v34 }
 0x8a4   : > { %v2063_v29 = vadd.f32 %v2384_v34, %v2062_v27 }
 0x8a6   : > { %v2989_v30 = vpop.f32.mrb[62].mxu1  ;;  %2105 = vmax.xlane.f32.xlu1 %v2063_v29  ;;  %2103 = vmax.xlane.f32.xlu0 %v4032_v28 }
 0x8a7   : > { %v2072_v31 = vpop.f32.mrb[63].mxu1  ;;  %v4041_v43 = vadd.f32 %v2989_v30, %v2384_v34 }
 0x8a8   : > { %v4037_v33 = vadd.f32 %v2384_v34, %v2072_v31 }
 0x8aa   : > { %2109 = vmax.xlane.f32.xlu1 %v4037_v33  ;;  %2107 = vmax.xlane.f32.xlu0 %v4035_v32 }
 0x8ae   : > { %2111 = vmax.xlane.f32.xlu0 %v4041_v43 }
 0x91a   : > { %v2084_v42 = vpop.xlane.xlu1 %2083 }
 0x91b   : > { %v4044_v6 = vsub.f32 %v2008_v36, %v2084_v42  ;;  %v2082_v13 = vpop.xlane.xlu0 %2081 }
 0x91c   : > { %v4046_v46 = vsub.f32 %v2003_v38, %v2082_v13 }
 0x91d   : > { %v2131_v45 = vmul.f32 1.442695, %v4044_v6 }
 0x91e   : > { %v2129_v10 = vmul.f32 1.442695, %v4046_v46 }
 0x91f   : > { %3216 = vpow2.f32 %v2131_v45  ;;  %v2088_v14 = vpop.xlane.xlu0 %2087 }
 0x920   : > { %3218 = vpow2.f32 %v2129_v10  ;;  %v4050_v9 = vsub.f32 %v2018_v1, %v2088_v14 }
 0x922   : > { %v2135_v50 = vmul.f32 1.442695, %v4050_v9 }
 0x923   : > { %v2090_v51 = vpop.xlane.xlu1 %2089  ;;  %v2086_v16 = vpop.xlane.xlu0 %2085 }
 0x924   : > { %3220 = vpow2.f32 %v2135_v50  ;;  %v4053_v62 = vsub.f32 %v2023_v24, %v2090_v51  ;;  %v4055_v54 = vsub.f32 %v2013_v4, %v2086_v16 }
 0x926   : > { %v2133_v57 = vmul.f32 1.442695, %v4055_v54  ;;  %v2137_v41 = vmul.f32 1.442695, %v4053_v62 }
 0x927   : > { %v2094_v12 = vpop.xlane.xlu1 %2093  ;;  %v2092_v47 = vpop.xlane.xlu0 %2091 }
 0x928   : > { %v4059_v44 = vsub.f32 %v2033_v11, %v2094_v12  ;;  %v4061_v48 = vsub.f32 %v2028_v7, %v2092_v47  ;;  %3222 = vpow2.f32 %v2133_v57 }
 0x929   : > { %v3217_v20 = vpop.eup %3216  ;;  %3224 = vpow2.f32 %v2137_v41 }
 0x92a   : > { %v3219_v52 = vpop.eup %3218  ;;  %v2139_v19 = vmul.f32 1.442695, %v4061_v48  ;;  %2163 = vadd.xlane.f32.xlu0 %v3217_v20  ;;  %v2141_v22 = vmul.f32 1.442695, %v4059_v44 }
 0x92b   : > { %v2098_v23 = vpop.xlane.xlu1 %2097  ;;  %2161 = vadd.xlane.f32.xlu1 %v3219_v52  ;;  %v2096_v60 = vpop.xlane.xlu0 %2095 }
 0x92c   : > { %v4065_v56 = vsub.f32 %v2043_v53, %v2098_v23  ;;  %v4067_v58 = vsub.f32 %v2038_v21, %v2096_v60  ;;  %3226 = vpow2.f32 %v2139_v19 }
 0x92d   : > { %3228 = vpow2.f32 %v2141_v22 }
 0x92e   : > { %v3221_v63 = vpop.eup %3220  ;;  %v2143_v61 = vmul.f32 1.442695, %v4067_v58  ;;  %v2145_v34 = vmul.f32 1.442695, %v4065_v56 }
 0x92f   : > { %v2102_v5 = vpop.xlane.xlu1 %2101  ;;  %2167 = vadd.xlane.f32.xlu0 %v3221_v63  ;;  %v2100_v3 = vpop.xlane.xlu0 %2099 }
 0x930   : > { %v4071_v35 = vsub.f32 %v2053_v25, %v2102_v5  ;;  %v4073_v36 = vsub.f32 %v2048_v8, %v2100_v3  ;;  %3230 = vpow2.f32 %v2143_v61 }
 0x931   : > { %3232 = vpow2.f32 %v2145_v34 }
 0x932   : > { %v2147_v37 = vmul.f32 1.442695, %v4073_v36  ;;  %v3223_v38 = vpop.eup %3222  ;;  %v2149_v15 = vmul.f32 1.442695, %v4071_v35 }
 0x933   : > { %v2106_v39 = vpop.xlane.xlu1 %2105  ;;  %v2104_v1 = vpop.xlane.xlu0 %2103  ;;  %2165 = vadd.xlane.f32.xlu1 %v3223_v38 }
 0x934   : > { %v4077_v0 = vsub.f32 %v2063_v29, %v2106_v39  ;;  %v4080_v18 = vsub.f32 %v4032_v28, %v2104_v1  ;;  %3234 = vpow2.f32 %v2147_v37  ;;  %v3225_v4 = vpop.eup %3224 }
 0x935   : > { %3236 = vpow2.f32 %v2149_v15 }
 0x936   : > { %v2151_v24 = vmul.f32 1.442695, %v4080_v18  ;;  %v3227_v2 = vpop.eup %3226  ;;  %v2153_v11 = vmul.f32 1.442695, %v4077_v0 }
 0x937   : > { %v2110_v40 = vpop.xlane.xlu1 %2109  ;;  %v2108_v7 = vpop.xlane.xlu0 %2107  ;;  %2169 = vadd.xlane.f32.xlu1 %v3225_v4  ;;  %2171 = vadd.xlane.f32.xlu0 %v3227_v2 }
 0x938   : > { %v4085_v49 = vsub.f32 %v4035_v32, %v2108_v7  ;;  %3238 = vpow2.f32 %v2151_v24  ;;  %v4088_v17 = vsub.f32 %v4037_v33, %v2110_v40  ;;  %v3229_v21 = vpop.eup %3228 }
 0x939   : > { %3240 = vpow2.f32 %v2153_v11 }
 0x93a   : > { %v2155_v53 = vmul.f32 1.442695, %v4085_v49  ;;  %v3231_v55 = vpop.eup %3230  ;;  %v2157_v25 = vmul.f32 1.442695, %v4088_v17 }
 0x93b   : > { %v2112_v59 = vpop.xlane.xlu0 %2111  ;;  %2173 = vadd.xlane.f32.xlu1 %v3229_v21  ;;  %2175 = vadd.xlane.f32.xlu0 %v3231_v55  ;;  %v3233_v26 = vpop.eup %3232 }
 0x93c   : > { %v4092_v8 = vsub.f32 %v4041_v43, %v2112_v59  ;;  %3242 = vpow2.f32 %v2155_v53 }
 0x93e   : > { %v2159_v27 = vmul.f32 1.442695, %v4092_v8  ;;  %v3235_v28 = vpop.eup %3234 }
 0x93f   : > { %2177 = vadd.xlane.f32.xlu1 %v3233_v26  ;;  %2179 = vadd.xlane.f32.xlu0 %v3235_v28  ;;  %v3237_v29 = vpop.eup %3236 }
 0x940   : > { %3244 = vpow2.f32 %v2159_v27 }
 0x941   : > { %3246 = vpow2.f32 %v2157_v25 }
 0x942   : > { %v3239_v30 = vpop.eup %3238 }
 0x943   : > { %2181 = vadd.xlane.f32.xlu1 %v3237_v29  ;;  %2183 = vadd.xlane.f32.xlu0 %v3239_v30  ;;  %v3241_v31 = vpop.eup %3240 }
 0x946   : > { %v3243_v32 = vpop.eup %3242 }
 0x947   : > { %2185 = vadd.xlane.f32.xlu1 %v3241_v31  ;;  %2187 = vadd.xlane.f32.xlu0 %v3243_v32 }
 0x94a   : > { %v3245_v33 = vpop.eup %3244 }
 0x94b   : > { %v3247_v43 = vpop.eup %3246  ;;  %2191 = vadd.xlane.f32.xlu0 %v3245_v33 }
 0x94c   : > { %2189 = vadd.xlane.f32.xlu1 %v3247_v43 }
 0x9b7   : > { %v2164_v42 = vpop.xlane.xlu0 %2163 }
 0x9b8   : > { %3248 = vlog2.f32 %v2164_v42  ;;  %v2162_v13 = vpop.xlane.xlu1 %2161 }
 0x9b9   : > { %3250 = vlog2.f32 %v2162_v13 }
 0x9bc   : > { %v2168_v45 = vpop.xlane.xlu0 %2167 }
 0x9bd   : > { %3252 = vlog2.f32 %v2168_v45 }
 0x9c0   : > { %v2166_v10 = vpop.xlane.xlu1 %2165 }
 0x9c1   : > { %3254 = vlog2.f32 %v2166_v10 }
 0x9c2   : > { %v3249_v14 = vpop.eup %3248 }
 0x9c3   : > { %v3251_v50 = vpop.eup %3250  ;;  %v2196_v51 = vmul.f32 0.6931472, %v3249_v14 }
 0x9c4   : > { %v2194_v16 = vmul.f32 0.6931472, %v3251_v50  ;;  %v2170_v12 = vpop.xlane.xlu1 %2169  ;;  %v2172_v47 = vpop.xlane.xlu0 %2171 }
 0x9c5   : > { %v2226_v57 = vsub.f32 %v4044_v6, %v2196_v51  ;;  %3256 = vlog2.f32 %v2170_v12 }
 0x9c6   : > { %v2225_v41 = vsub.f32 %v4046_v46, %v2194_v16  ;;  %3258 = vlog2.f32 %v2172_v47 }
 0x9c7   : > { %v3253_v20 = vpop.eup %3252  ;;  %2242 = vst [vmem:[%s4100_s12 + $0x8] sm:$0xff] %v2226_v57 }
 0x9c8   : > { %2241 = vst [vmem:[%s4100_s12] sm:$0xff] %v2225_v41  ;;  %v2200_v52 = vmul.f32 0.6931472, %v3253_v20  ;;  %v2174_v19 = vpop.xlane.xlu1 %2173  ;;  %v2176_v23 = vpop.xlane.xlu0 %2175 }
 0x9c9   : > { %3260 = vlog2.f32 %v2174_v19 }
 0x9ca   : > { %v2228_v60 = vsub.f32 %v4050_v9, %v2200_v52  ;;  %3262 = vlog2.f32 %v2176_v23 }
 0x9cb   : > { %v3255_v22 = vpop.eup %3254 }
 0x9cc   : > { %2244 = vst [vmem:[%s4100_s12 + $0x18] sm:$0xff] %v2228_v60  ;;  %v2198_v6 = vmul.f32 0.6931472, %v3255_v22  ;;  %v2178_v63 = vpop.xlane.xlu1 %2177  ;;  %v2180_v61 = vpop.xlane.xlu0 %2179 }
 0x9cd   : > { %3264 = vlog2.f32 %v2178_v63 }
 0x9ce   : > { %v2227_v46 = vsub.f32 %v4055_v54, %v2198_v6  ;;  %3266 = vlog2.f32 %v2180_v61 }
 0x9cf   : > { %v3257_v5 = vpop.eup %3256 }
 0x9d0   : > { %v3259_v3 = vpop.eup %3258  ;;  %2243 = vst [vmem:[%s4100_s12 + $0x10] sm:$0xff] %v2227_v46  ;;  %v2202_v34 = vmul.f32 0.6931472, %v3257_v5  ;;  %v2182_v37 = vpop.xlane.xlu1 %2181 }
 0x9d1   : > { %v2184_v38 = vpop.xlane.xlu0 %2183  ;;  %v2204_v9 = vmul.f32 0.6931472, %v3259_v3  ;;  %3268 = vlog2.f32 %v2182_v37 }
 0x9d2   : > { %v2229_v39 = vsub.f32 %v4053_v62, %v2202_v34  ;;  %3270 = vlog2.f32 %v2184_v38 }
 0x9d3   : > { %v3261_v1 = vpop.eup %3260  ;;  %v2230_v15 = vsub.f32 %v4061_v48, %v2204_v9 }
 0x9d4   : > { %v3263_v4 = vpop.eup %3262  ;;  %2245 = vst [vmem:[%s4100_s12 + $0x20] sm:$0xff] %v2229_v39  ;;  %v2206_v54 = vmul.f32 0.6931472, %v3261_v1  ;;  %v2186_v24 = vpop.xlane.xlu1 %2185 }
 0x9d5   : > { %v2188_v2 = vpop.xlane.xlu0 %2187  ;;  %2246 = vst [vmem:[%s4100_s12 + $0x28] sm:$0xff] %v2230_v15  ;;  %v2208_v40 = vmul.f32 0.6931472, %v3263_v4  ;;  %3272 = vlog2.f32 %v2186_v24 }
 0x9d6   : > { %v2231_v7 = vsub.f32 %v4059_v44, %v2206_v54  ;;  %3274 = vlog2.f32 %v2188_v2 }
 0x9d7   : > { %v3265_v11 = vpop.eup %3264  ;;  %v2232_v62 = vsub.f32 %v4067_v58, %v2208_v40 }
 0x9d8   : > { %v3267_v21 = vpop.eup %3266  ;;  %2247 = vst [vmem:[%s4100_s12 + $0x30] sm:$0xff] %v2231_v7  ;;  %v2210_v48 = vmul.f32 0.6931472, %v3265_v11 }
 0x9d9   : > { %v2190_v53 = vpop.xlane.xlu1 %2189  ;;  %v2192_v55 = vpop.xlane.xlu0 %2191  ;;  %2248 = vst [vmem:[%s4100_s12 + $0x38] sm:$0xff] %v2232_v62  ;;  %v2212_v59 = vmul.f32 0.6931472, %v3267_v21 }
 0x9da   : > { %3276 = vlog2.f32 %v2190_v53  ;;  %v2233_v25 = vsub.f32 %v4065_v56, %v2210_v48 }
 0x9db   : > { %3278 = vlog2.f32 %v2192_v55  ;;  %v3269_v44 = vpop.eup %3268  ;;  %v2234_v26 = vsub.f32 %v4073_v36, %v2212_v59 }
 0x9dc   : > { %v3271_v27 = vpop.eup %3270  ;;  %2249 = vst [vmem:[%s4100_s12 + $0x40] sm:$0xff] %v2233_v25  ;;  %v2214_v58 = vmul.f32 0.6931472, %v3269_v44 }
 0x9dd   : > { %2250 = vst [vmem:[%s4100_s12 + $0x48] sm:$0xff] %v2234_v26  ;;  %v2216_v28 = vmul.f32 0.6931472, %v3271_v27 }
 0x9de   : > { %v2235_v29 = vsub.f32 %v4071_v35, %v2214_v58 }
 0x9df   : > { %v3273_v30 = vpop.eup %3272  ;;  %v2236_v31 = vsub.f32 %v4080_v18, %v2216_v28 }
 0x9e0   : > { %v3275_v32 = vpop.eup %3274  ;;  %2251 = vst [vmem:[%s4100_s12 + $0x50] sm:$0xff] %v2235_v29  ;;  %v2218_v56 = vmul.f32 0.6931472, %v3273_v30 }
 0x9e1   : > { %2252 = vst [vmem:[%s4100_s12 + $0x58] sm:$0xff] %v2236_v31  ;;  %v2220_v33 = vmul.f32 0.6931472, %v3275_v32 }
 0x9e2   : > { %v2237_v36 = vsub.f32 %v4077_v0, %v2218_v56 }
 0x9e3   : > { %v2238_v42 = vsub.f32 %v4085_v49, %v2220_v33 }
 0x9e4   : > { %v3277_v43 = vpop.eup %3276  ;;  %2253 = vst [vmem:[%s4100_s12 + $0x60] sm:$0xff] %v2237_v36 }
 0x9e5   : > { %v3279_v13 = vpop.eup %3278  ;;  %v2222_v45 = vmul.f32 0.6931472, %v3277_v43  ;;  %2254 = vst [vmem:[%s4100_s12 + $0x68] sm:$0xff] %v2238_v42 }
 0x9e6   : > { %v2224_v35 = vmul.f32 0.6931472, %v3279_v13 }
 0x9e7   : > { %v2239_v10 = vsub.f32 %v4088_v17, %v2222_v45 }
 0x9e8   : > { %v2240_v18 = vsub.f32 %v4092_v8, %v2224_v35 }
 0x9e9   : > { %2255 = vst [vmem:[%s4100_s12 + $0x70] sm:$0xff] %v2239_v10 }
 0x9ea   : > { %2256 = vst [vmem:[%s4100_s12 + $0x78] sm:$0xff] %v2240_v18 }
 0x9eb PF: > { %s19_s30 = sadd.s32 1, %s3286_s30  }
 0x9ec   : > { %p16_p4 = scmp.ge.s32.totalorder %s19_s30, 6  }
 0x9ee   :  { %18 = sbr.rel (!%p16_p4) target bundleno = 1 (0x1), region = 89 }

</bundles_post_ra>
